<compile_context>
chip_gen: v7x
topology: tpu7x:2x2x1
jax: 0.10.0
libtpu: 0.0.40
codegen_flags: <defaults>
</compile_context>

<pallas_src>
import jax
import jax.numpy as jnp
from jax.experimental import pallas as pl
from jax.experimental.pallas import tpu as pltpu


def _pick_tiles(R, n, C, itemsize, target_bytes=8 << 20):
    """Choose (row_tile, channel_tile) so the input block (tr, n, tc) is
    ~target_bytes, tr is a multiple of 8 (or the full R), and tc is a multiple
    of 128 (or the full C)."""
    # Channel tile: only split C when even the 8-row block would be too big.
    if C > 128 and 8 * n * C * itemsize > target_bytes:
        tc = (target_bytes // (8 * n * itemsize)) // 128 * 128
        tc = int(max(128, min(tc, C)))
    else:
        tc = C
    # Row tile.
    tr = target_bytes // max(1, n * tc * itemsize)
    tr = int(max(8, (tr // 8) * 8))
    if tr >= R:
        tr = R  # single row-block; legal because it equals the full dim
    # Make sure v7x's two TensorCores both get work when the problem allows it.
    if pl.cdiv(R, tr) * pl.cdiv(C, tc) < 2 and R >= 16:
        tr = max(8, ((tr // 2) // 8) * 8)
    return tr, tc


def _make_reduce_kernel(tr, n, M, dim, exclude):
    """Kernel over blocks: x (tr, n, tc) -> o (tr, tc), max over axis 1 (the
    reduced object axis), optionally zeroing entries whose full object-index
    tuple has a repeated index."""

    def kernel(x_ref, o_ref):
        x = x_ref[...]  # (tr, n, tc): n on sublanes, tc on lanes
        if exclude and dim >= 2:
            # Build the exclude mask directly in the block layout (tr, n, 1):
            # iota along dim 0 is a per-outer-index splat, iota along dim 1 a
            # sublane iota -- no lane<->sublane relayout, broadcast over C is a
            # cheap lane splat.  Rows past R (padded last block) decode to
            # garbage but their outputs are discarded by the masked store.
            row = pl.program_id(0) * tr + jax.lax.broadcasted_iota(
                jnp.int32, (tr, n, 1), 0)
            j = jax.lax.broadcasted_iota(jnp.int32, (tr, n, 1), 1)
            m = row % M  # flat leading-object index within the batch element
            idxs = [j]
            r = m
            for _ in range(dim - 1):
                idxs.append(r % n)
                r = r // n
            excl = jnp.zeros((tr, n, 1), dtype=jnp.bool_)
            for a in range(len(idxs)):
                for b in range(a + 1, len(idxs)):
                    excl = jnp.logical_or(excl, idxs[a] == idxs[b])
            # NOTE: fill with 0 (not -inf) to match the reference zero-then-max.
            x = jnp.where(excl, 0.0, x)
        # Memory-bound kernel: the cross-sublane max stays hidden under the DMA.
        o_ref[...] = jnp.max(x, axis=1)  # (tr, tc) -- lane-dense store

    return kernel


def reduce_max_one(x, dim, exclude_self):
    """x: [B] + [obj]*dim + [C]  ->  [B] + [obj]*(dim-1) + [C]
    (max over the last object axis, with the exclude-self mask for arity>1)."""
    assert dim >= 1 and x.ndim == dim + 2
    B = x.shape[0]
    C = x.shape[-1]
    n = x.shape[-2]
    lead_obj = tuple(x.shape[1:-2])  # dim-1 leading object axes
    if exclude_self and dim > 1:
        # The base-n decode of the flattened row index assumes every object
        # axis has the same extent (true for NLM SparseTensors).
        assert all(s == n for s in lead_obj), (
            "exclude-self mask decode requires all object dims to share extent n")
    M = 1
    for s in lead_obj:
        M *= s
    R = B * M
    xf = x.reshape(R, n, C)

    itemsize = jnp.dtype(x.dtype).itemsize
    tr, tc = _pick_tiles(R, n, C, itemsize)
    grid = (pl.cdiv(R, tr), pl.cdiv(C, tc))

    in_block_bytes = tr * n * tc * itemsize
    out_block_bytes = tr * tc * itemsize
    # Double-buffered footprint + margin; keep well under v7x's 64 MiB VMEM.
    vmem_limit = int(min(48 << 20,
                         max(16 << 20,
                             2 * (in_block_bytes + out_block_bytes) + (2 << 20))))

    cost = pl.CostEstimate(
        flops=R * n * C,  # advisory: compare/select work of the max reduce
        transcendentals=0,
        bytes_accessed=(R * n * C + R * C) * itemsize,
    )

    out = pl.pallas_call(
        _make_reduce_kernel(tr, n, M, dim, exclude_self),
        out_shape=jax.ShapeDtypeStruct((R, C), x.dtype),
        grid_spec=pl.GridSpec(
            grid=grid,
            in_specs=[pl.BlockSpec((tr, n, tc), lambda i, c: (i, 0, c))],
            out_specs=pl.BlockSpec((tr, tc), lambda i, c: (i, c)),
        ),
        compiler_params=pltpu.CompilerParams(
            dimension_semantics=("parallel", "parallel"),
            vmem_limit_bytes=vmem_limit,
        ),
        cost_estimate=cost,
    )(xf)
    return out.reshape((B,) + lead_obj + (C,))


class SparseReducer:
    """Reduce out a variable via quantifiers (exists), implemented by max-pooling."""

    def __init__(self, dim, exclude_self=True, max=True, min=True, mean=True, sum=True):
        self.dim = dim
        self.exclude_self = exclude_self
        # The reference forward only performs the 'max' (exists) reduction; the
        # other flags are kept for API parity.
        self.max = max
        self.min = min
        self.mean = mean
        self.sum = sum

    def __call__(self, inputs):
        # Group same-layout predicates and concatenate along channels so one
        # pallas_call amortizes per-call overhead and keeps lanes dense.
        groups = {}
        for idx, v in enumerate(inputs):
            key = (tuple(v.shape[:-1]), jnp.dtype(v.dtype).name)
            groups.setdefault(key, []).append(idx)

        outputs = [None] * len(inputs)
        for _, idxs in groups.items():
            vs = [inputs[i] for i in idxs]
            cat = vs[0] if len(vs) == 1 else jnp.concatenate(vs, axis=-1)
            # Match the reference forward: exclude-self masking for arity > 1.
            red = reduce_max_one(cat, self.dim, self.dim > 1)
            off = 0
            for i, v in zip(idxs, vs):
                c = v.shape[-1]
                outputs[i] = red[..., off:off + c] if len(vs) > 1 else red
                off += c
        return outputs

    forward = __call__

    def get_output_dim(self, input_dim):
        return input_dim


# TODO(synk): the SparseTensor COO bookkeeping (v.val / v.exclude_mask() /
# reduce_arity dispatch) has no Pallas equivalent; this operates on the
# equivalent dense [B, n, ..., n, C] layout.


def _ref_reduce(x, dim, exclude):
    """Pure-JAX reference: zero repeated-index tuples (arity>1), max over last obj axis."""
    if exclude and dim > 1:
        n = x.shape[-2]
        grids = jnp.meshgrid(*([jnp.arange(n)] * dim), indexing="ij")
        excl = jnp.zeros((n,) * dim, dtype=bool)
        for a in range(dim):
            for b in range(a + 1, dim):
                excl = excl | (grids[a] == grids[b])
        x = jnp.where(excl[None, ..., None], 0.0, x)
    return jnp.max(x, axis=-2)


if __name__ == "__main__":
    key = jax.random.PRNGKey(0)
    k1, k2, k3, k4, k5 = jax.random.split(key, 5)

    B, n, C = 2, 16, 128
    ok = True

    # Arity-2 predicates (binary relations), two same-shape inputs
    # (exercises the channel-concat path): [B, n, n, C] -> [B, n, C]
    x2a = jax.random.uniform(k1, (B, n, n, C), dtype=jnp.float32)
    x2b = jax.random.uniform(k2, (B, n, n, C), dtype=jnp.float32)
    outs2 = SparseReducer(dim=2)([x2a, x2b])
    for x, o in zip([x2a, x2b], outs2):
        o = jax.block_until_ready(o)
        ref = _ref_reduce(x, 2, True)
        ok = ok and (o.shape == ref.shape) and bool(jnp.allclose(o, ref, atol=1e-6))

    # Arity-1 predicates: [B, n, C] -> [B, C] (no exclude mask; rows == batch)
    x1 = jax.random.uniform(k3, (B, n, C), dtype=jnp.float32)
    (o1,) = SparseReducer(dim=1)([x1])
    o1 = jax.block_until_ready(o1)
    ref1 = _ref_reduce(x1, 1, False)
    ok = ok and (o1.shape == ref1.shape) and bool(jnp.allclose(o1, ref1, atol=1e-6))

    # Arity-3 predicates (general exclude-mask decode): [B, 8, 8, 8, C]
    n3 = 8
    x3 = jax.random.uniform(k4, (B, n3, n3, n3, C), dtype=jnp.float32)
    (o3,) = SparseReducer(dim=3)([x3])
    o3 = jax.block_until_ready(o3)
    ref3 = _ref_reduce(x3, 3, True)
    ok = ok and (o3.shape == ref3.shape) and bool(jnp.allclose(o3, ref3, atol=1e-6))

    # Arity-2 with n not a multiple of 8 and C not a multiple of 128
    # (exercises cdiv partial row blocks and masked lane stores).
    x2c = jax.random.uniform(k5, (3, 10, 10, 96), dtype=jnp.float32)
    (o2c,) = SparseReducer(dim=2)([x2c])
    o2c = jax.block_until_ready(o2c)
    ref2c = _ref_reduce(x2c, 2, True)
    ok = ok and (o2c.shape == ref2c.shape) and bool(jnp.allclose(o2c, ref2c, atol=1e-6))

    if not ok:
        raise AssertionError("Pallas SparseReducer mismatch vs reference max-reduce")
    print("KERNEL_OK")
</pallas_src>

<mosaic_0001>
module attributes {stable_mosaic.version = 11 : i64} {
  func.func @kernel(%arg0: i32, %arg1: i32, %arg2: memref<16x16x256xf32, #tpu.memory_space<vmem>>, %arg3: memref<16x256xf32, #tpu.memory_space<vmem>>) attributes {dimension_semantics = [#tpu.dimension_semantics<parallel>, #tpu.dimension_semantics<parallel>], iteration_bounds = array<i64: 2, 1>, scalar_prefetch = 0 : i64, scratch_operands = 0 : i64, tpu.core_type = #tpu.core_type<tc>, window_params = [{transform_indices = @transform_0, window_bounds = array<i64: 16, 16, 256>}, {transform_indices = @transform_1, window_bounds = array<i64: 16, 256>}]} {
    %c0 = arith.constant 0 : index
    %c0_0 = arith.constant 0 : index
    %c0_1 = arith.constant 0 : index
    %0 = vector.load %arg2[%c0, %c0_0, %c0_1] : memref<16x16x256xf32, #tpu.memory_space<vmem>>, vector<16x16x256xf32>
    %c16_i32 = arith.constant 16 : i32
    %1 = arith.muli %arg0, %c16_i32 : i32
    %2 = tpu.iota {dimensions = array<i32: 0>} : vector<16x16x1xi32>
    %3 = vector.broadcast %1 : i32 to vector<16x16x1xi32>
    %4 = arith.addi %3, %2 : vector<16x16x1xi32>
    %5 = tpu.iota {dimensions = array<i32: 1>} : vector<16x16x1xi32>
    %c16_i32_2 = arith.constant 16 : i32
    %c0_i32 = arith.constant 0 : i32
    %6 = arith.cmpi eq, %c16_i32_2, %c0_i32 : i32
    %c1_i32 = arith.constant 1 : i32
    %7 = arith.select %6, %c1_i32, %c16_i32_2 : i32
    %8 = vector.broadcast %7 : i32 to vector<16x16x1xi32>
    %9 = arith.remsi %4, %8 : vector<16x16x1xi32>
    %c0_i32_3 = arith.constant 0 : i32
    %10 = vector.broadcast %c0_i32_3 : i32 to vector<16x16x1xi32>
    %11 = arith.cmpi ne, %9, %10 : vector<16x16x1xi32>
    %c0_i32_4 = arith.constant 0 : i32
    %12 = vector.broadcast %c0_i32_4 : i32 to vector<16x16x1xi32>
    %13 = arith.cmpi slt, %9, %12 : vector<16x16x1xi32>
    %c0_i32_5 = arith.constant 0 : i32
    %14 = arith.cmpi slt, %7, %c0_i32_5 : i32
    %15 = vector.broadcast %14 : i1 to vector<16x16x1xi1>
    %16 = vector.broadcast %15 : vector<16x16x1xi1> to vector<16x16x1xi1>
    %17 = arith.xori %13, %16 : vector<16x16x1xi1>
    %18 = arith.andi %17, %11 : vector<16x16x1xi1>
    %19 = vector.broadcast %7 : i32 to vector<16x16x1xi32>
    %20 = arith.addi %9, %19 : vector<16x16x1xi32>
    %21 = arith.select %18, %20, %9 : vector<16x16x1xi1>, vector<16x16x1xi32>
    %c16_i32_6 = arith.constant 16 : i32
    %c0_i32_7 = arith.constant 0 : i32
    %22 = arith.cmpi eq, %c16_i32_6, %c0_i32_7 : i32
    %c1_i32_8 = arith.constant 1 : i32
    %23 = arith.select %22, %c1_i32_8, %c16_i32_6 : i32
    %24 = vector.broadcast %23 : i32 to vector<16x16x1xi32>
    %25 = arith.remsi %21, %24 : vector<16x16x1xi32>
    %c0_i32_9 = arith.constant 0 : i32
    %26 = vector.broadcast %c0_i32_9 : i32 to vector<16x16x1xi32>
    %27 = arith.cmpi ne, %25, %26 : vector<16x16x1xi32>
    %c0_i32_10 = arith.constant 0 : i32
    %28 = vector.broadcast %c0_i32_10 : i32 to vector<16x16x1xi32>
    %29 = arith.cmpi slt, %25, %28 : vector<16x16x1xi32>
    %c0_i32_11 = arith.constant 0 : i32
    %30 = arith.cmpi slt, %23, %c0_i32_11 : i32
    %31 = vector.broadcast %30 : i1 to vector<16x16x1xi1>
    %32 = vector.broadcast %31 : vector<16x16x1xi1> to vector<16x16x1xi1>
    %33 = arith.xori %29, %32 : vector<16x16x1xi1>
    %34 = arith.andi %33, %27 : vector<16x16x1xi1>
    %35 = vector.broadcast %23 : i32 to vector<16x16x1xi32>
    %36 = arith.addi %25, %35 : vector<16x16x1xi32>
    %37 = arith.select %34, %36, %25 : vector<16x16x1xi1>, vector<16x16x1xi32>
    %false = arith.constant false
    %38 = vector.broadcast %false : i1 to vector<16x16x1xi1>
    %39 = arith.cmpi eq, %5, %37 : vector<16x16x1xi32>
    %40 = arith.ori %38, %39 : vector<16x16x1xi1>
    %cst = arith.constant 0.000000e+00 : f32
    %41 = vector.shape_cast %40 : vector<16x16x1xi1> to vector<16x16x1xi1>
    %42 = vector.broadcast %41 : vector<16x16x1xi1> to vector<16x16x256xi1>
    %43 = vector.broadcast %cst : f32 to vector<16x16x256xf32>
    %44 = arith.select %42, %43, %0 : vector<16x16x256xi1>, vector<16x16x256xf32>
    %cst_12 = arith.constant dense<0xFF800000> : vector<16x256xf32>
    %45 = vector.multi_reduction <maximumf>, %44, %cst_12 [1] : vector<16x16x256xf32> to vector<16x256xf32>
    %c0_13 = arith.constant 0 : index
    %c0_14 = arith.constant 0 : index
    %46 = vector.load %arg3[%c0_13, %c0_14] : memref<16x256xf32, #tpu.memory_space<vmem>>, vector<16x256xf32>
    tpu.vector_store %arg3[%c0_13, %c0_14], %45 {strides = array<i32>} : memref<16x256xf32, #tpu.memory_space<vmem>>, vector<16x256xf32>,
    return
  }
  func.func @transform_0(%arg0: i32, %arg1: i32) -> (i32, i32, i32) {
    %c0_i32 = arith.constant 0 : i32
    %c0_i32_0 = arith.constant 0 : i32
    return %arg0, %c0_i32, %arg1 : i32, i32, i32
  }
  func.func @transform_1(%arg0: i32, %arg1: i32) -> (i32, i32) {
    %c0_i32 = arith.constant 0 : i32
    return %arg0, %arg1 : i32, i32
  }
}

</mosaic_0001>

<bundles_post_ra>
// kernel: tpu_custom_call.1
= control target key start
LH: loop header
LB: loop body
LE: loop exit
PB: predicated region body
PF: predicated region fallthrough
CT: control target
= control target key end

     0   :  { %6 = vsyncpa [#allocation3], 0  ;;  %s2951_s0 = inlined_call_operand.hbm [shape: f32[32,16,256], index: 0, kind: input, shape index: {}]   ;;  %s2952_s1 = inlined_call_operand.hbm [shape: f32[32,256], index: 1, kind: output, shape index: {}]  }
   0x1   :  { %8 = vsyncpa [#allocation3 + $0x1], 0 }
   0x2   :  { %9 = vsyncpa [#allocation4], 0 }
   0x3   :  { %11 = vsyncpa [#allocation4 + $0x1], 0  ;;  %s1439_s6 = smov 0   ;;  %s1441_s7 = smov 0  }
   0x4   :  { %s1443_s8 = smov 0   ;;  %s1445_s9 = smov 0  }
   0x5   :  { %s1447_s10 = smov 0   ;;  %s1449_s11 = smov 0  }
   0x6 LB: > { %s1189_s12 = sadd.s32 4294967295, %s1421_s11   ;;  %s1190_s13 = sadd.s32 4294967294, %s1421_s11   ;;  %s1421_s11 = sphi %s1449_s11, %s17_s11   ;;  %s1417_s10 = sphi %s1447_s10, %s3121_s10   ;;  %s1413_s9 = sphi %s1445_s9, %s3120_s9   ;;  %s1409_s8 = sphi %s1443_s8, %s3119_s8   ;;  %s1405_s7 = sphi %s1441_s7, %s3118_s7   ;;  %s1401_s6 = sphi %s1439_s6, %s3117_s6  }
   0x7   : > { %s29_s14 = sadd.s32 1, %s1417_s10  ;;  %s38_s15 = sadd.s32 1, %s1409_s8 }
   0x8   : > { %p31_p0 = scmp.ge.s32.totalorder %s29_s14, 2  ;;  %p45_p1 = scmp.ne.s32.totalorder %s1409_s8, %s1405_s7 }
   0x9   : > { %p46_p2 = scmp.eq.s32.totalorder %s1421_s11, 0  ;;  %p51_p3 = scmp.ne.s32.totalorder %s1405_s7, %s1401_s6 }
   0xa   : > { %s3123_s14 = smov (%p31_p0, %s29_s14), 0  ;;  %p52_p5 = scmp.eq.s32.totalorder %s1189_s12, 0 }
   0xb   : > { %p1480_p4 = por %p46_p2, %p45_p1  ;;  %s33_s17 = ssub.s32 %s1417_s10, %s3123_s14 }
   0xc   : > { %p77_p6 = scmp.eq.s32.totalorder %s1189_s12, 1  ;;  %p36_p7 = scmp.eq.s32.totalorder %s33_s17, 0 }
   0xd   : > { %p1486_p8 = por %p52_p5, %p51_p3  ;;  %p83_p10 = scmp.eq.s32.totalorder %s1190_s13, 1 }
   0xe   : > { %p1490_p9 = por %p77_p6, %p45_p1  ;;  %p1255_p13 = scmp.lt.s32.totalorder %s1421_s11, 2 }
   0xf   : > { %s1495_s20 = scalar_select %p36_p7, %s1409_s8, %s38_s15  }
  0x10   : > { %s2956_s19 = scalar_select %p1490_p9, 1, 0 }
  0x11   : > { %p1497_p11 = por %p83_p10, %p51_p3  ;;  %s103_s22 = sand.u32 1, %s1409_s8  }
  0x12   : > { %s1193_s23 = sshll.u32 %s103_s22, 9  ;;  %s1240_s24 = sshll.u32 %s1417_s10, 13 }
  0x13   : > { %s2957_s21 = scalar_select %p1497_p11, 1, 0 }
  0x14   : > { %s1508_s27 = scalar_lea.hbm %s2951_s0, %s1240_s24  ;;  %s107_s28 = scalar_lea.vmem [#allocation2], %s1193_s23 }
  0x15   : > { %s117_s29 = sshll.u32 %s107_s28, 4  ;;  %p1514_p0 = pnand %p1255_p13, %p1480_p4  ;;  %s1510_s29 = int_to_ptr.vmem [resolvable:$true] %s117_s29 }
  0x16   : > { %s1519_s2 = scalar_lea.sflag [#allocation3], %s103_s22  ;;  %s1309_s3 = scalar_lea.hbm %s1508_s27, 8192 }
  0x17   : > { %p1310_p2 = scmp.ne.s32.totalorder %s1508_s27, %s1309_s3  ;;  %p1311_p3 = pneg %p1514_p0 }
  0x18   : > { %s1314_s12 = scalar_lea.hbm %s2951_s0, 16384  ;;  %p1315_p4 = scmp.lt.u32.totalorder %s1508_s27, %s2951_s0 }
  0x19   : > { %p1312_p5 = pnand %p1311_p3, %p1310_p2  ;;  %p1316_p7 = scmp.lt.u32.totalorder %s1314_s12, %s1309_s3 }
  0x1a   : > { %p1318_p13 = scmp.lt.u32.totalorder %s1309_s3, %s1508_s27 }
  0x1b   : > { %p1313_p6 = pneg %p1312_p5  ;;  %p1317_p10 = por %p1316_p7, %p1315_p4 }
  0x1d   : > { %p1319_p12 = por %p1318_p13, %p1317_p10 }
  0x1f   : > { %p1320_p1 = pnand %p1319_p12, %p1313_p6 }
  0x21   : > { %1323 = shalt.err (!%p1320_p1)
}
  0x22   : > { %s1324_s16 = scalar_lea.vmem %s1510_s29, 8192  ;;  %s1423_s17 = smov [#allocation2]  }
  0x23   : > { %p1325_p2 = scmp.ne.s32.totalorder %s1510_s29, %s1324_s16  ;;  %s1329_s22 = sshll.u32 %s1423_s17, 4  ;;  %s1330_s22 = int_to_ptr.vmem [resolvable:$false] %s1329_s22 }
  0x24   : > { %s1331_s23 = scalar_lea.vmem %s1330_s22, 16384  ;;  %p1332_p9 = scmp.lt.s32.totalorder %s1510_s29, %s1330_s22 }
  0x25   : > { %p1327_p5 = pnand %p1325_p2, %p1311_p3  ;;  %p1333_p4 = scmp.lt.s32.totalorder %s1331_s23, %s1324_s16 }
  0x27   : > { %p1328_p11 = pneg %p1327_p5  ;;  %p1334_p7 = por %p1333_p4, %p1332_p9 }
  0x29   : > { %p1335_p10 = pnand %p1334_p7, %p1328_p11 }
  0x2b   : > { %1338 = shalt.err (!%p1335_p10)
}
  0x2c   : > { %s1424_s24 = smov 256   ;;  %s1425_s25 = smov 16  }
  0x2d   : > { %1250 = dma.hbm_to_vmem [thread:$0]  (!%p1514_p0), %s1508_s27, 8192, %s1510_s29, %s1519_s2, %s1424_s24, %s1424_s24, %s1425_s25  }
  0x2e   : > { %p125_p12 = scmp.lt.s32.totalorder %s1421_s11, 3  ;;  %p2959_p1 = scmp.ge.s32.totalorder %s1421_s11, 1 }
  0x30   : > { %p126_p3 = pnand %p2959_p1, %p125_p12 }
  0x32   : > { %129 = sbr.rel (%p126_p3) target bundleno = 253 (0xfd), region = 24 }
  0x39   : > { %s1551_s26 = sand.u32 1, %s1405_s7  }
  0x3a   : > { %s1198_s28 = sshll.u32 %s1551_s26, 9  ;;  %s132_s3 = scalar_lea.sflag [#allocation3], %s1551_s26 }
  0x3b   : > { %s1555_s4 = scalar_lea.vmem [#allocation2], %s1198_s28 }
  0x3c   : > { %1392 = dma.done.wait (%p1486_p8), %s132_s3, 8192  }
  0x3d   : > { %1394 = vsyncadd (%p1486_p8), %s132_s3, 4294959104  ;;  %s1200_s27 = sshll.u32 %s1413_s9, 4  ;;  %v239_v6 = vlaneseq  ;;  %s1199_s18 = sshll.u32 %s1551_s26, 5 }
  0x3e   : > { %v223_v0 = vstv %s1200_s27  ;;  %s1242_s29 = sshll.u32 %s1413_s9, 9  ;;  %s153_s30 = scalar_lea.vmem [#allocation5], %s1199_s18 }
  0x3f   : > { %v224_v1 = vadd.s32 1, %v223_v0  ;;  %v225_v2 = vadd.s32 2, %v223_v0  ;;  %v1562_v3 = vadd.s32 3, %v223_v0  ;;  %v1564_v4 = vadd.s32 4, %v223_v0  ;;  %s1102_s2 = sshll.u32 %s153_s30, 4  ;;  %s2892_s12 = scalar_lea.hbm %s2952_s1, %s1242_s29  ;;  %s2894_s2 = int_to_ptr.vmem [resolvable:$true] %s1102_s2 }
  0x40   : > { %v1566_v5 = vadd.s32 5, %v223_v0  ;;  %v243_v7 = vsub.s32 0, %v223_v0  ;;  %v1568_v10 = vadd.s32 6, %v223_v0  ;;  %v1571_v14 = vadd.s32 7, %v223_v0  ;;  %s1086_s13 = scalar_lea.sflag [#allocation4], %s1551_s26  ;;  %s1339_s15 = scalar_lea.vmem %s2894_s2, 512 }
  0x41   : > { %v250_v8 = vsub.s32 0, %v224_v1  ;;  %v257_v9 = vsub.s32 0, %v225_v2  ;;  %v264_v13 = vsub.s32 0, %v1562_v3  ;;  %v271_v16 = vsub.s32 0, %v1564_v4  ;;  %p1340_p8 = scmp.ne.s32.totalorder %s2894_s2, %s1339_s15  ;;  %p3114_p9 = scmp.ne.s32.totalorder %s2956_s19, 0 }
  0x42   : > { %v1201_v11 = vmin.u32 %v243_v7, %v223_v0  ;;  %v1574_v17 = vadd.s32 8, %v223_v0  ;;  %v1576_v18 = vadd.s32 9, %v223_v0  ;;  %v1578_v19 = vshrl.u32 %v239_v6, 7  ;;  %s1426_s16 = smov [#allocation5]  }
  0x43   : > { %v1202_v12 = vmin.u32 %v250_v8, %v224_v1  ;;  %v1203_v15 = vmin.u32 %v257_v9, %v225_v2  ;;  %v278_v20 = vsub.s32 0, %v1566_v5  ;;  %v1581_v21 = vadd.s32 10, %v223_v0  ;;  %p1341_p11 = pnand %p1340_p8, %p3114_p9  ;;  %s1343_s17 = sshll.u32 %s1426_s16, 4  ;;  %s1344_s17 = int_to_ptr.vmem [resolvable:$false] %s1343_s17 }
  0x44   : > { %v1583_v22 = vadd.s32 11, %v223_v0  ;;  %v246_v23 = vand.u32 15, %v1201_v11  ;;  %v1204_v24 = vmin.u32 %v264_v13, %v1562_v3  ;;  %v1586_v25 = vadd.s32 12, %v223_v0  ;;  %s1345_s22 = scalar_lea.vmem %s1344_s17, 1024  ;;  %p1346_p6 = scmp.lt.s32.totalorder %s2894_s2, %s1344_s17 }
  0x45   : > { %v1588_v26 = vadd.s32 13, %v223_v0  ;;  %v253_v27 = vand.u32 15, %v1202_v12  ;;  %v285_v28 = vsub.s32 0, %v1568_v10  ;;  %v1591_v29 = vadd.s32 14, %v223_v0  ;;  %p1342_p0 = pneg %p1341_p11  ;;  %p1347_p13 = scmp.lt.s32.totalorder %s1345_s22, %s1339_s15 }
  0x46   : > { %v1593_v30 = vadd.s32 15, %v223_v0  ;;  %v260_v31 = vand.u32 15, %v1203_v15  ;;  %v1205_v32 = vmin.u32 %v271_v16, %v1564_v4  ;;  %v1597_v33 = vadd.s32 8, %v1578_v19 }
  0x47   : > { %vm242_vm0 = vcmp.lt.s32.totalorder %v223_v0, 0  ;;  %vm249_vm1 = vcmp.lt.s32.totalorder %v224_v1, 0  ;;  %v1206_v34 = vmin.u32 %v278_v20, %v1566_v5  ;;  %v247_v35 = vsub.s32 0, %v246_v23  ;;  %p1348_p2 = por %p1347_p13, %p1346_p6 }
  0x48   : > { %vm256_vm2 = vcmp.lt.s32.totalorder %v225_v2, 0  ;;  %v267_v36 = vand.u32 15, %v1204_v24  ;;  %v292_v37 = vsub.s32 0, %v1571_v14  ;;  %v254_v38 = vsub.s32 0, %v253_v27 }
  0x49   : > { %vm263_vm3 = vcmp.lt.s32.totalorder %v1562_v3, 0  ;;  %v1207_v39 = vmin.u32 %v285_v28, %v1568_v10  ;;  %v299_v40 = vsub.s32 0, %v1574_v17  ;;  %v261_v41 = vsub.s32 0, %v260_v31  ;;  %p1349_p5 = pnand %p1348_p2, %p1342_p0 }
  0x4a   : > { %vm270_vm4 = vcmp.lt.s32.totalorder %v1564_v4, 0  ;;  %v274_v42 = vand.u32 15, %v1205_v32  ;;  %vm277_vm5 = vcmp.lt.s32.totalorder %v1566_v5, 0  ;;  %v281_v43 = vand.u32 15, %v1206_v34 }
  0x4b   : > { %vm284_vm6 = vcmp.lt.s32.totalorder %v1568_v10, 0  ;;  %v1208_v44 = vmin.u32 %v292_v37, %v1571_v14  ;;  %v306_v45 = vsub.s32 0, %v1576_v18  ;;  %v1610_v46 = vsel %vm242_vm0, %v247_v35, %v246_v23 }
  0x4c   : > { %v268_v47 = vsub.s32 0, %v267_v36  ;;  %vm291_vm7 = vcmp.lt.s32.totalorder %v1571_v14, 0  ;;  %v1209_v48 = vmin.u32 %v299_v40, %v1574_v17  ;;  %v313_v49 = vsub.s32 0, %v1581_v21 }
  0x4d   : > { %v1616_v50 = vsel %vm249_vm1, %v254_v38, %v253_v27  ;;  %v288_v51 = vand.u32 15, %v1207_v39  ;;  %v1210_v52 = vmin.u32 %v306_v45, %v1576_v18  ;;  %v320_v53 = vsub.s32 0, %v1583_v22 }
  0x4e   : > { %v1621_v54 = vsel %vm256_vm2, %v261_v41, %v260_v31  ;;  %v275_v55 = vsub.s32 0, %v274_v42  ;;  %v1211_v56 = vmin.u32 %v313_v49, %v1581_v21  ;;  %v327_v57 = vsub.s32 0, %v1586_v25 }
  0x4f   : > { %v282_v58 = vsub.s32 0, %v281_v43  ;;  %v295_v59 = vand.u32 15, %v1208_v44  ;;  %v1212_v60 = vmin.u32 %v320_v53, %v1583_v22  ;;  %v334_v61 = vsub.s32 0, %v1588_v26 }
  0x50   : > { %v1629_v62 = vsel %vm263_vm3, %v268_v47, %v267_v36  ;;  %v302_v63 = vand.u32 15, %v1209_v48  ;;  %v309_v0 = vand.u32 15, %v1210_v52  ;;  %v1213_v1 = vmin.u32 %v327_v57, %v1586_v25 }
  0x51   : > { %v289_v2 = vsub.s32 0, %v288_v51  ;;  %v316_v6 = vand.u32 15, %v1211_v56  ;;  %v323_v7 = vand.u32 15, %v1212_v60  ;;  %v1214_v8 = vmin.u32 %v334_v61, %v1588_v26 }
  0x52   : > { %v1635_v9 = vsel %vm270_vm4, %v275_v55, %v274_v42  ;;  %vm298_vm8 = vcmp.lt.s32.totalorder %v1574_v17, 0  ;;  %v330_v11 = vand.u32 15, %v1213_v1  ;;  %v341_v3 = vsub.s32 0, %v1591_v29 }
  0x53   : > { %v1641_v12 = vsel %vm277_vm5, %v282_v58, %v281_v43  ;;  %v296_v13 = vsub.s32 0, %v295_v59  ;;  %vm305_vm9 = vcmp.lt.s32.totalorder %v1576_v18, 0  ;;  %v337_v15 = vand.u32 15, %v1214_v8 }
  0x54   : > { %v303_v16 = vsub.s32 0, %v302_v63  ;;  %v310_v20 = vsub.s32 0, %v309_v0  ;;  %v1215_v23 = vmin.u32 %v341_v3, %v1591_v29  ;;  %v348_v4 = vsub.s32 0, %v1593_v30 }
  0x55   : > { %v1648_v24 = vsel %vm284_vm6, %v289_v2, %v288_v51  ;;  %vm312_vm10 = vcmp.lt.s32.totalorder %v1581_v21, 0  ;;  %v317_v27 = vsub.s32 0, %v316_v6  ;;  %v324_v5 = vsub.s32 0, %v323_v7 }
  0x56   : > { %vm319_vm11 = vcmp.lt.s32.totalorder %v1583_v22, 0  ;;  %v331_v28 = vsub.s32 0, %v330_v11  ;;  %v344_v31 = vand.u32 15, %v1215_v23  ;;  %v1216_v32 = vmin.u32 %v348_v4, %v1593_v30 }
  0x57   : > { %v1655_v34 = vsel %vm291_vm7, %v296_v13, %v295_v59  ;;  %vm326_vm12 = vcmp.lt.s32.totalorder %v1586_v25, 0  ;;  %vm333_vm13 = vcmp.lt.s32.totalorder %v1588_v26, 0  ;;  %v338_v10 = vsub.s32 0, %v337_v15 }
  0x58   : > { %v1661_v21 = vsel %vm298_vm8, %v303_v16, %v302_v63  ;;  %v1665_v22 = vsel %vm305_vm9, %v310_v20, %v309_v0  ;;  %vm340_vm14 = vcmp.lt.s32.totalorder %v1591_v29, 0  ;;  %v351_v35 = vand.u32 15, %v1216_v32 }
  0x59   : > { %v1668_v36 = vsel %vm312_vm10, %v317_v27, %v316_v6  ;;  %v1670_v14 = vsel %vm319_vm11, %v324_v5, %v323_v7  ;;  %vm347_vm15 = vcmp.lt.s32.totalorder %v1593_v30, 0  ;;  %vm354_vm0 = vcmp.ne.s32.totalorder %v1610_v46, 0 }
  0x5a   : > { %v1674_v25 = vsel %vm326_vm12, %v331_v28, %v330_v11  ;;  %v345_v17 = vsub.s32 0, %v344_v31  ;;  %vm355_vm1 = vcmp.ne.s32.totalorder %v1616_v50, 0  ;;  %vm356_vm2 = vcmp.ne.s32.totalorder %v1621_v54, 0 }
  0x5b   : > { %v1678_v18 = vsel %vm333_vm13, %v338_v10, %v337_v15  ;;  %v352_v26 = vsub.s32 0, %v351_v35  ;;  %vm357_vm3 = vcmp.ne.s32.totalorder %v1629_v62, 0  ;;  %vm370_vm4 = vcmp.lt.s32.totalorder %v1610_v46, 0 }
  0x5c   : > { %vm371_vm8 = vcmp.lt.s32.totalorder %v1616_v50, 0  ;;  %vm361_vm9 = vcmp.ne.s32.totalorder %v1655_v34, 0  ;;  %vm372_vm12 = vcmp.lt.s32.totalorder %v1621_v54, 0  ;;  %v1692_v37 = vsel %vm340_vm14, %v345_v17, %v344_v31  ;;  %vm1699_vm5 = vmand %vm370_vm4, %vm354_vm0 }
  0x5d   : > { %vm373_vm7 = vcmp.lt.s32.totalorder %v1629_v62, 0  ;;  %v1705_v39 = vsel %vm347_vm15, %v352_v26, %v351_v35  ;;  %vm374_vm14 = vcmp.lt.s32.totalorder %v1635_v9, 0  ;;  %vm375_vm13 = vcmp.lt.s32.totalorder %v1641_v12, 0  ;;  %vm1712_vm6 = vmand %vm371_vm8, %vm355_vm1 }
  0x5e   : > { %v402_v40 = vadd.s32 16, %v1610_v46  ;;  %vm376_vm4 = vcmp.lt.s32.totalorder %v1648_v24, 0  ;;  %vm1724_vm11 = vmand %vm372_vm12, %vm356_vm2  ;;  %v403_v41 = vadd.s32 16, %v1616_v50  ;;  %v404_v42 = vadd.s32 16, %v1621_v54 }
  0x5f   : > { %vm1738_vm2 = vmand %vm373_vm7, %vm357_vm3  ;;  %v405_v44 = vadd.s32 16, %v1629_v62  ;;  %vm383_vm8 = vcmp.lt.s32.totalorder %v1678_v18, 0  ;;  %vm384_vm0 = vcmp.lt.s32.totalorder %v1692_v37, 0  ;;  %vm2968_vm10 = vcmp.ne.s32.totalorder %v1635_v9, 0 }
  0x60   : > { %vm1751_vm15 = vmand %vm374_vm14, %vm2968_vm10  ;;  %vm369_vm3 = vcmp.ne.s32.totalorder %v1705_v39, 0  ;;  %vm385_vm7 = vcmp.lt.s32.totalorder %v1705_v39, 0  ;;  %vm2971_vm12 = vcmp.ne.s32.totalorder %v1641_v12, 0  ;;  %v406_v48 = vadd.s32 16, %v1635_v9 }
  0x61   : > { %vm1761_vm1 = vmand %vm375_vm13, %vm2971_vm12  ;;  %v407_v49 = vadd.s32 16, %v1641_v12  ;;  %v1770_v51 = vsel %vm1699_vm5, %v402_v40, %v1610_v46  ;;  %vm2974_vm10 = vcmp.ne.s32.totalorder %v1648_v24, 0  ;;  %v408_v53 = vadd.s32 16, %v1648_v24 }
  0x62   : > { %vm1776_vm14 = vmand %vm376_vm4, %vm2974_vm10  ;;  %v409_v55 = vadd.s32 16, %v1655_v34  ;;  %v1785_v56 = vsel %vm1712_vm6, %v403_v41, %v1616_v50  ;;  %v1790_v46 = vsel %vm1724_vm11, %v404_v42, %v1621_v54  ;;  %vm2977_vm5 = vcmp.lt.s32.totalorder %v1655_v34, 0 }
  0x63   : > { %vm1796_vm13 = vmand %vm2977_vm5, %vm361_vm9  ;;  %v410_v58 = vadd.s32 16, %v1661_v21  ;;  %v411_v59 = vadd.s32 16, %v1665_v22  ;;  %v412_v50 = vadd.s32 16, %v1668_v36  ;;  %v1806_v60 = vsel %vm1738_vm2, %v405_v44, %v1629_v62 }
  0x64   : > { %vm2980_vm6 = vcmp.ne.s32.totalorder %v1661_v21, 0  ;;  %vm2981_vm11 = vcmp.lt.s32.totalorder %v1661_v21, 0  ;;  %v413_v61 = vadd.s32 16, %v1670_v14  ;;  %v414_v63 = vadd.s32 16, %v1674_v25 }
  0x65   : > { %vm1812_vm4 = vmand %vm2981_vm11, %vm2980_vm6  ;;  %v415_v0 = vadd.s32 16, %v1678_v18  ;;  %v435_v1 = vsub.s32 0, %v1770_v51  ;;  %vm2984_vm9 = vcmp.ne.s32.totalorder %v1665_v22, 0  ;;  %vm2985_vm2 = vcmp.lt.s32.totalorder %v1665_v22, 0 }
  0x66   : > { %vm1824_vm12 = vmand %vm2985_vm2, %vm2984_vm9  ;;  %v416_v2 = vadd.s32 16, %v1692_v37  ;;  %v1832_v6 = vsel %vm1751_vm15, %v406_v48, %v1635_v9  ;;  %v442_v7 = vsub.s32 0, %v1785_v56  ;;  %v449_v8 = vsub.s32 0, %v1790_v46 }
  0x67   : > { %vm2988_vm10 = vcmp.ne.s32.totalorder %v1668_v36, 0  ;;  %vm2989_vm5 = vcmp.lt.s32.totalorder %v1668_v36, 0  ;;  %v417_v3 = vadd.s32 16, %v1705_v39  ;;  %v1848_v13 = vsel %vm1761_vm1, %v407_v49, %v1641_v12 }
  0x68   : > { %vm1840_vm6 = vmand %vm2989_vm5, %vm2988_vm10  ;;  %v1217_v9 = vmin.u32 %v435_v1, %v1770_v51  ;;  %v456_v15 = vsub.s32 0, %v1806_v60  ;;  %vm2992_vm15 = vcmp.ne.s32.totalorder %v1670_v14, 0  ;;  %vm2993_vm11 = vcmp.lt.s32.totalorder %v1670_v14, 0 }
  0x69   : > { %vm1856_vm9 = vmand %vm2993_vm11, %vm2992_vm15  ;;  %v1863_v20 = vsel %vm1776_vm14, %v408_v53, %v1648_v24  ;;  %v1868_v12 = vsel %vm1796_vm13, %v409_v55, %v1655_v34  ;;  %v1218_v23 = vmin.u32 %v442_v7, %v1785_v56  ;;  %v1219_v4 = vmin.u32 %v449_v8, %v1790_v46 }
  0x6a   : > { %vm2996_vm1 = vcmp.ne.s32.totalorder %v1674_v25, 0  ;;  %vm2997_vm2 = vcmp.lt.s32.totalorder %v1674_v25, 0  ;;  %v1883_v24 = vsel %vm1812_vm4, %v410_v58, %v1661_v21  ;;  %v1888_v5 = vsel %vm1824_vm12, %v411_v59, %v1665_v22 }
  0x6b   : > { %vm1876_vm10 = vmand %vm2997_vm2, %vm2996_vm1  ;;  %v1220_v28 = vmin.u32 %v456_v15, %v1806_v60  ;;  %v463_v31 = vsub.s32 0, %v1832_v6  ;;  %vm3000_vm14 = vcmp.ne.s32.totalorder %v1678_v18, 0  ;;  %vm434_vm4 = vcmp.lt.s32.totalorder %v1770_v51, 0 }
  0x6c   : > { %vm1896_vm13 = vmand %vm383_vm8, %vm3000_vm14  ;;  %v438_v34 = vand.u32 15, %v1217_v9  ;;  %vm441_vm5 = vcmp.lt.s32.totalorder %v1785_v56, 0  ;;  %v445_v10 = vand.u32 15, %v1218_v23  ;;  %vm3003_vm12 = vcmp.ne.s32.totalorder %v1692_v37, 0 }
  0x6d   : > { %vm400_vm15 = vmand %vm384_vm0, %vm3003_vm12  ;;  %v1909_v21 = vsel %vm1840_vm6, %v412_v50, %v1668_v36  ;;  %vm448_vm8 = vcmp.lt.s32.totalorder %v1790_v46, 0  ;;  %v452_v22 = vand.u32 15, %v1219_v4  ;;  %v1221_v35 = vmin.u32 %v463_v31, %v1832_v6 }
  0x6e   : > { %v1916_v17 = vsel %vm1856_vm9, %v413_v61, %v1670_v14  ;;  %v1921_v26 = vsel %vm1876_vm10, %v414_v63, %v1674_v25  ;;  %vm455_vm0 = vcmp.lt.s32.totalorder %v1806_v60, 0  ;;  %v470_v36 = vsub.s32 0, %v1848_v13  ;;  %vm401_vm6 = vmand %vm385_vm7, %vm369_vm3 }
  0x6f   : > { %v1932_v38 = vsel %vm1896_vm13, %v415_v0, %v1678_v18  ;;  %v459_v14 = vand.u32 15, %v1220_v28  ;;  %vm462_vm11 = vcmp.lt.s32.totalorder %v1832_v6, 0  ;;  %v477_v25 = vsub.s32 0, %v1863_v20 }
  0x70   : > { %v1937_v29 = vsel %vm400_vm15, %v416_v2, %v1692_v37  ;;  %v439_v40 = vsub.s32 0, %v438_v34  ;;  %v446_v30 = vsub.s32 0, %v445_v10  ;;  %v1222_v41 = vmin.u32 %v470_v36, %v1848_v13 }
  0x71   : > { %v453_v42 = vsub.s32 0, %v452_v22  ;;  %v466_v43 = vand.u32 15, %v1221_v35  ;;  %v1223_v44 = vmin.u32 %v477_v25, %v1863_v20  ;;  %v484_v45 = vsub.s32 0, %v1868_v12 }
  0x72   : > { %v1943_v18 = vsel %vm401_vm6, %v417_v3, %v1705_v39  ;;  %vm469_vm3 = vcmp.lt.s32.totalorder %v1848_v13, 0  ;;  %vm476_vm7 = vcmp.lt.s32.totalorder %v1863_v20, 0  ;;  %v491_v37 = vsub.s32 0, %v1883_v24 }
  0x73   : > { %v460_v47 = vsub.s32 0, %v459_v14  ;;  %v473_v48 = vand.u32 15, %v1222_v41  ;;  %v1224_v49 = vmin.u32 %v484_v45, %v1868_v12  ;;  %v498_v52 = vsub.s32 0, %v1888_v5  ;;  %v174_v45 = vld [vmem:[%s1555_s4 + $0x80] sm:$0xff] }
  0x74   : > { %v1952_v53 = vsel %vm434_vm4, %v439_v40, %v438_v34  ;;  %v1956_v39 = vsel %vm441_vm5, %v446_v30, %v445_v10  ;;  %v1225_v55 = vmin.u32 %v491_v37, %v1883_v24  ;;  %v505_v57 = vsub.s32 0, %v1909_v21  ;;  %v176_v37 = vld [vmem:[%s1555_s4 + $0x90] sm:$0xff] }
  0x75   : > { %v1962_v58 = vsel %vm448_vm8, %v453_v42, %v452_v22  ;;  %v467_v59 = vsub.s32 0, %v466_v43  ;;  %v480_v50 = vand.u32 15, %v1223_v44  ;;  %v1226_v54 = vmin.u32 %v498_v52, %v1888_v5 }
  0x76   : > { %vm483_vm9 = vcmp.lt.s32.totalorder %v1868_v12, 0  ;;  %v487_v51 = vand.u32 15, %v1224_v49  ;;  %v1227_v61 = vmin.u32 %v505_v57, %v1909_v21  ;;  %v512_v56 = vsub.s32 0, %v1916_v17  ;;  %v182_v57 = vld [vmem:[%s1555_s4 + $0xc0] sm:$0xff] }
  0x77   : > { %v1970_v63 = vsel %vm455_vm0, %v460_v47, %v459_v14  ;;  %v474_v0 = vsub.s32 0, %v473_v48  ;;  %vm490_vm1 = vcmp.lt.s32.totalorder %v1883_v24, 0  ;;  %v494_v46 = vand.u32 15, %v1225_v55 }
  0x78   : > { %v501_v1 = vand.u32 15, %v1226_v54  ;;  %v508_v62 = vand.u32 15, %v1227_v61  ;;  %v1228_v2 = vmin.u32 %v512_v56, %v1916_v17  ;;  %v519_v7 = vsub.s32 0, %v1921_v26  ;;  %v183_v61 = vld [vmem:[%s1555_s4 + $0xc8] sm:$0xff] }
  0x79   : > { %v1977_v8 = vsel %vm462_vm11, %v467_v59, %v466_v43  ;;  %v481_v11 = vsub.s32 0, %v480_v50  ;;  %vm497_vm2 = vcmp.lt.s32.totalorder %v1888_v5, 0  ;;  %v526_v60 = vsub.s32 0, %v1932_v38  ;;  %v171_v43 = vld [vmem:[%s1555_s4 + $0x68] sm:$0xff] }
  0x7a   : > { %v488_v3 = vsub.s32 0, %v487_v51  ;;  %vm504_vm10 = vcmp.lt.s32.totalorder %v1909_v21, 0  ;;  %v515_v9 = vand.u32 15, %v1228_v2  ;;  %v1229_v15 = vmin.u32 %v519_v7, %v1921_v26 }
  0x7b   : > { %v495_v16 = vsub.s32 0, %v494_v46  ;;  %vm511_vm14 = vcmp.lt.s32.totalorder %v1916_v17, 0  ;;  %v1230_v23 = vmin.u32 %v526_v60, %v1932_v38  ;;  %v533_v6 = vsub.s32 0, %v1937_v29 }
  0x7c   : > { %v1988_v4 = vsel %vm469_vm3, %v474_v0, %v473_v48  ;;  %v502_v27 = vsub.s32 0, %v501_v1  ;;  %v509_v28 = vsub.s32 0, %v508_v62  ;;  %v522_v31 = vand.u32 15, %v1229_v15  ;;  %v178_v48 = vld [vmem:[%s1555_s4 + $0xa0] sm:$0xff] }
  0x7d   : > { %v1992_v32 = vsel %vm476_vm7, %v481_v11, %v480_v50  ;;  %v529_v34 = vand.u32 15, %v1230_v23  ;;  %v1231_v10 = vmin.u32 %v533_v6, %v1937_v29  ;;  %v540_v22 = vsub.s32 0, %v1943_v18 }
  0x7e   : > { %v1998_v35 = vsel %vm483_vm9, %v488_v3, %v487_v51  ;;  %v516_v36 = vsub.s32 0, %v515_v9  ;;  %vm518_vm13 = vcmp.lt.s32.totalorder %v1921_v26, 0  ;;  %vm525_vm4 = vcmp.lt.s32.totalorder %v1932_v38, 0  ;;  %v172_v38 = vld [vmem:[%s1555_s4 + $0x70] sm:$0xff]  ;;  %v189_v3 = vld [vmem:[%s1555_s4 + $0xf8] sm:$0xff] }
  0x7f   : > { %v2004_v13 = vsel %vm490_vm1, %v495_v16, %v494_v46  ;;  %v523_v20 = vsub.s32 0, %v522_v31  ;;  %v536_v14 = vand.u32 15, %v1231_v10  ;;  %v1232_v25 = vmin.u32 %v540_v22, %v1943_v18  ;;  %v159_v22 = vld [vmem:[%s1555_s4 + $0x8] sm:$0xff] }
  0x80   : > { %v2009_v40 = vsel %vm497_vm2, %v502_v27, %v501_v1  ;;  %v2013_v12 = vsel %vm504_vm10, %v509_v28, %v508_v62  ;;  %vm532_vm5 = vcmp.lt.s32.totalorder %v1937_v29, 0  ;;  %vm539_vm12 = vcmp.lt.s32.totalorder %v1943_v18, 0  ;;  %v173_v29 = vld [vmem:[%s1555_s4 + $0x78] sm:$0xff]  ;;  %v175_v18 = vld [vmem:[%s1555_s4 + $0x88] sm:$0xff] }
  0x81   : > { %v530_v30 = vsub.s32 0, %v529_v34  ;;  %v537_v24 = vsub.s32 0, %v536_v14  ;;  %v543_v41 = vand.u32 15, %v1232_v25  ;;  %vm546_vm15 = vcmp.ne.s32.totalorder %v1952_v53, 0  ;;  %v163_v25 = vld [vmem:[%s1555_s4 + $0x28] sm:$0xff] }
  0x82   : > { %v2020_v42 = vsel %vm511_vm14, %v516_v36, %v515_v9  ;;  %vm547_vm8 = vcmp.ne.s32.totalorder %v1956_v39, 0  ;;  %vm548_vm0 = vcmp.ne.s32.totalorder %v1962_v58, 0  ;;  %vm549_vm6 = vcmp.ne.s32.totalorder %v1970_v63, 0  ;;  %v161_v36 = vld [vmem:[%s1555_s4 + $0x18] sm:$0xff] }
  0x83   : > { %v2027_v5 = vsel %vm518_vm13, %v523_v20, %v522_v31  ;;  %v544_v21 = vsub.s32 0, %v543_v41  ;;  %vm550_vm11 = vcmp.ne.s32.totalorder %v1977_v8, 0  ;;  %vm562_vm9 = vcmp.lt.s32.totalorder %v1952_v53, 0 }
  0x84   : > { %vm563_vm1 = vcmp.lt.s32.totalorder %v1956_v39, 0  ;;  %vm564_vm2 = vcmp.lt.s32.totalorder %v1962_v58, 0  ;;  %v2037_v17 = vsel %vm525_vm4, %v530_v30, %v529_v34  ;;  %v2041_v26 = vsel %vm532_vm5, %v537_v24, %v536_v14  ;;  %vm2047_vm13 = vmand %vm562_vm9, %vm546_vm15  ;;  %v166_v30 = vld [vmem:[%s1555_s4 + $0x40] sm:$0xff]  ;;  %v192_v34 = vld [vmem:[%s1555_s4 + $0x110] sm:$0xff] }
  0x85   : > { %vm565_vm14 = vcmp.lt.s32.totalorder %v1970_v63, 0  ;;  %v2053_v44 = vsel %vm539_vm12, %v544_v21, %v543_v41  ;;  %vm566_vm5 = vcmp.lt.s32.totalorder %v1977_v8, 0  ;;  %vm2060_vm10 = vmand %vm563_vm1, %vm547_vm8  ;;  %vm567_vm12 = vcmp.lt.s32.totalorder %v1988_v4, 0  ;;  %v167_v41 = vld [vmem:[%s1555_s4 + $0x48] sm:$0xff]  ;;  %v170_v21 = vld [vmem:[%s1555_s4 + $0x60] sm:$0xff] }
  0x86   : > { %vm2072_vm7 = vmand %vm564_vm2, %vm548_vm0  ;;  %vm568_vm15 = vcmp.lt.s32.totalorder %v1992_v32, 0  ;;  %vm570_vm2 = vcmp.lt.s32.totalorder %v2004_v13, 0  ;;  %vm573_vm4 = vcmp.lt.s32.totalorder %v2020_v42, 0  ;;  %vm3014_vm8 = vcmp.ne.s32.totalorder %v1988_v4, 0 }
  0x87   : > { %vm2084_vm3 = vmand %vm565_vm14, %vm549_vm6  ;;  %v594_v47 = vadd.s32 16, %v1952_v53  ;;  %v595_v49 = vadd.s32 16, %v1956_v39  ;;  %v596_v52 = vadd.s32 16, %v1962_v58  ;;  %v597_v55 = vadd.s32 16, %v1970_v63 }
  0x88   : > { %vm2097_vm9 = vmand %vm566_vm5, %vm550_vm11  ;;  %vm3017_vm5 = vcmp.ne.s32.totalorder %v1992_v32, 0  ;;  %v598_v59 = vadd.s32 16, %v1977_v8  ;;  %v599_v50 = vadd.s32 16, %v1988_v4  ;;  %v600_v54 = vadd.s32 16, %v1992_v32 }
  0x89   : > { %vm2108_vm1 = vmand %vm567_vm12, %vm3014_vm8  ;;  %vm3020_vm12 = vcmp.ne.s32.totalorder %v1998_v35, 0  ;;  %vm3021_vm8 = vcmp.lt.s32.totalorder %v1998_v35, 0  ;;  %v601_v51 = vadd.s32 16, %v1998_v35  ;;  %v602_v56 = vadd.s32 16, %v2004_v13 }
  0x8a   : > { %vm2118_vm6 = vmand %vm568_vm15, %vm3017_vm5  ;;  %vm3024_vm15 = vcmp.ne.s32.totalorder %v2004_v13, 0  ;;  %v603_v0 = vadd.s32 16, %v2009_v40  ;;  %v604_v46 = vadd.s32 16, %v2013_v12  ;;  %v605_v1 = vadd.s32 16, %v2020_v42 }
  0x8b   : > { %vm2129_vm0 = vmand %vm3021_vm8, %vm3020_vm12  ;;  %vm3027_vm12 = vcmp.ne.s32.totalorder %v2009_v40, 0  ;;  %vm3028_vm8 = vcmp.lt.s32.totalorder %v2009_v40, 0  ;;  %v606_v2 = vadd.s32 16, %v2027_v5  ;;  %v607_v7 = vadd.s32 16, %v2037_v17 }
  0x8c   : > { %vm2141_vm5 = vmand %vm570_vm2, %vm3024_vm15  ;;  %v608_v11 = vadd.s32 16, %v2041_v26  ;;  %v2163_v60 = vsel %vm2047_vm13, %v594_v47, %v1952_v53  ;;  %vm3031_vm2 = vcmp.ne.s32.totalorder %v2013_v12, 0  ;;  %vm3032_vm15 = vcmp.lt.s32.totalorder %v2013_v12, 0  ;;  %v177_v47 = vld [vmem:[%s1555_s4 + $0x98] sm:$0xff] }
  0x8d   : > { %vm2153_vm11 = vmand %vm3028_vm8, %vm3027_vm12  ;;  %v609_v9 = vadd.s32 16, %v2053_v44  ;;  %v2177_v15 = vsel %vm2060_vm10, %v595_v49, %v1956_v39  ;;  %v2182_v53 = vsel %vm2072_vm7, %v596_v52, %v1962_v58  ;;  %v2187_v16 = vsel %vm2084_vm3, %v597_v55, %v1970_v63  ;;  %v179_v49 = vld [vmem:[%s1555_s4 + $0xa8] sm:$0xff]  ;;  %v180_v52 = vld [vmem:[%s1555_s4 + $0xb0] sm:$0xff] }
  0x8e   : > { %vm2169_vm14 = vmand %vm3032_vm15, %vm3031_vm2  ;;  %vm3035_vm13 = vcmp.ne.s32.totalorder %v2020_v42, 0  ;;  %v2200_v39 = vsel %vm2097_vm9, %v598_v59, %v1977_v8  ;;  %v2205_v58 = vsel %vm2108_vm1, %v599_v50, %v1988_v4  ;;  %v2210_v63 = vsel %vm2118_vm6, %v600_v54, %v1992_v32  ;;  %v158_v32 = vld [vmem:[%s1555_s4] sm:$0xff]  ;;  %v181_v55 = vld [vmem:[%s1555_s4 + $0xb8] sm:$0xff] }
  0x8f   : > { %vm2193_vm12 = vmand %vm573_vm4, %vm3035_vm13  ;;  %v2215_v6 = vsel %vm2129_vm0, %v601_v51, %v1998_v35  ;;  %vm3038_vm3 = vcmp.ne.s32.totalorder %v2027_v5, 0  ;;  %vm3039_vm7 = vcmp.lt.s32.totalorder %v2027_v5, 0  ;;  %v2228_v4 = vsel %vm2141_vm5, %v602_v56, %v2004_v13  ;;  %v160_v35 = vld [vmem:[%s1555_s4 + $0x10] sm:$0xff]  ;;  %v162_v13 = vld [vmem:[%s1555_s4 + $0x20] sm:$0xff] }
  0x90   : > { %vm2221_vm10 = vmand %vm3039_vm7, %vm3038_vm3  ;;  %v2233_v27 = vsel %vm2153_vm11, %v603_v0, %v2009_v40  ;;  %vm626_vm4 = vcmp.eq.s32.totalorder %v1578_v19, %v2163_v60  ;;  %vm627_vm9 = vcmp.eq.s32.totalorder %v1597_v33, %v2163_v60  ;;  %vm3042_vm1 = vcmp.ne.s32.totalorder %v2037_v17, 0  ;;  %v164_v40 = vld [vmem:[%s1555_s4 + $0x30] sm:$0xff]  ;;  %v185_v0 = vld [vmem:[%s1555_s4 + $0xd8] sm:$0xff] }
  0x91   : > { %vm3043_vm0 = vcmp.lt.s32.totalorder %v2037_v17, 0  ;;  %v2250_v31 = vsel %vm2169_vm14, %v604_v46, %v2013_v12  ;;  %vm628_vm11 = vcmp.eq.s32.totalorder %v1578_v19, %v2177_v15  ;;  %vm629_vm5 = vcmp.eq.s32.totalorder %v1597_v33, %v2177_v15  ;;  %v165_v12 = vld [vmem:[%s1555_s4 + $0x38] sm:$0xff]  ;;  %v184_v56 = vld [vmem:[%s1555_s4 + $0xd0] sm:$0xff]  ;;  %v186_v46 = vld [vmem:[%s1555_s4 + $0xe0] sm:$0xff] }
  0x92   : > { %vm2243_vm6 = vmand %vm3043_vm0, %vm3042_vm1  ;;  %vm630_vm8 = vcmp.eq.s32.totalorder %v1578_v19, %v2182_v53  ;;  %vm3046_vm2 = vcmp.ne.s32.totalorder %v2041_v26, 0  ;;  %vm3047_vm15 = vcmp.lt.s32.totalorder %v2041_v26, 0  ;;  %v2270_v10 = vsel %vm2193_vm12, %v605_v1, %v2020_v42  ;;  %v168_v42 = vld [vmem:[%s1555_s4 + $0x50] sm:$0xff] }
  0x93   : > { %vm2263_vm13 = vmand %vm3047_vm15, %vm3046_vm2  ;;  %vm631_vm14 = vcmp.eq.s32.totalorder %v1597_v33, %v2182_v53  ;;  %vm632_vm3 = vcmp.eq.s32.totalorder %v1578_v19, %v2187_v16  ;;  %vm3050_vm1 = vcmp.ne.s32.totalorder %v2053_v44, 0  ;;  %vm3051_vm12 = vcmp.lt.s32.totalorder %v2053_v44, 0  ;;  %v188_v60 = vld [vmem:[%s1555_s4 + $0xf0] sm:$0xff] }
  0x94   : > { %vm2286_vm0 = vmand %vm3051_vm12, %vm3050_vm1  ;;  %v2293_v14 = vsel %vm2221_vm10, %v606_v2, %v2027_v5  ;;  %vm634_vm2 = vcmp.eq.s32.totalorder %v1578_v19, %v2200_v39  ;;  %vm635_vm15 = vcmp.eq.s32.totalorder %v1597_v33, %v2200_v39  ;;  %vm636_vm7 = vcmp.eq.s32.totalorder %v1578_v19, %v2205_v58  ;;  %v169_v5 = vld [vmem:[%s1555_s4 + $0x58] sm:$0xff] }
  0x95   : > { %v2308_v24 = vsel %vm2243_vm6, %v607_v7, %v2037_v17  ;;  %vm637_vm10 = vcmp.eq.s32.totalorder %v1597_v33, %v2205_v58  ;;  %v2323_v17 = vsel %vm2263_vm13, %v608_v11, %v2041_v26  ;;  %v2338_v26 = vsel %vm2286_vm0, %v609_v9, %v2053_v44  ;;  %v187_v11 = vld [vmem:[%s1555_s4 + $0xe8] sm:$0xff]  ;;  %v190_v9 = vld [vmem:[%s1555_s4 + $0x100] sm:$0xff] }
  0x96   : > { %vm643_vm13 = vcmp.eq.s32.totalorder %v1597_v33, %v2228_v4  ;;  %vm645_vm12 = vcmp.eq.s32.totalorder %v1597_v33, %v2233_v27  ;;  %vm648_vm1 = vcmp.eq.s32.totalorder %v1578_v19, %v2270_v10  ;;  %v2359_v44 = vsel %vm626_vm4, 0.0, %v158_v32  ;;  %v191_v32 = vld [vmem:[%s1555_s4 + $0x108] sm:$0xff] }
  0x97   : > { %vm649_vm6 = vcmp.eq.s32.totalorder %v1597_v33, %v2270_v10  ;;  %v2372_v59 = vsel %vm626_vm4, 0.0, %v159_v22  ;;  %v2377_v50 = vsel %vm627_vm9, 0.0, %v160_v35  ;;  %v2382_v54 = vsel %vm627_vm9, 0.0, %v161_v36  ;;  %v193_v22 = vld [vmem:[%s1555_s4 + $0x118] sm:$0xff]  ;;  %v194_v35 = vld [vmem:[%s1555_s4 + $0x120] sm:$0xff] }
  0x98   : > { %v2387_v51 = vsel %vm628_vm11, 0.0, %v162_v13  ;;  %vm651_vm4 = vcmp.eq.s32.totalorder %v1597_v33, %v2293_v14  ;;  %vm652_vm0 = vcmp.eq.s32.totalorder %v1578_v19, %v2308_v24  ;;  %v2400_v1 = vsel %vm628_vm11, 0.0, %v163_v25  ;;  %v195_v25 = vld [vmem:[%s1555_s4 + $0x128] sm:$0xff] }
  0x99   : > { %v2405_v62 = vsel %vm629_vm5, 0.0, %v164_v40  ;;  %v2410_v2 = vsel %vm629_vm5, 0.0, %v165_v12  ;;  %v2415_v7 = vsel %vm630_vm8, 0.0, %v166_v30  ;;  %vm653_vm9 = vcmp.eq.s32.totalorder %v1597_v33, %v2308_v24  ;;  %v196_v40 = vld [vmem:[%s1555_s4 + $0x130] sm:$0xff]  ;;  %v197_v12 = vld [vmem:[%s1555_s4 + $0x138] sm:$0xff]  ;;  %v198_v30 = vld [vmem:[%s1555_s4 + $0x140] sm:$0xff] }
  0x9a   : > { %v2428_v15 = vsel %vm630_vm8, 0.0, %v167_v41  ;;  %v2433_v23 = vsel %vm631_vm14, 0.0, %v168_v42  ;;  %v2438_v8 = vsel %vm631_vm14, 0.0, %v169_v5  ;;  %v2443_v28 = vsel %vm632_vm3, 0.0, %v170_v21  ;;  %v199_v21 = vld [vmem:[%s1555_s4 + $0x148] sm:$0xff] }
  0x9b   : > { %vm655_vm5 = vcmp.eq.s32.totalorder %v1597_v33, %v2323_v17  ;;  %vm656_vm8 = vcmp.eq.s32.totalorder %v1578_v19, %v2338_v26  ;;  %v2456_v53 = vsel %vm632_vm3, 0.0, %v171_v43  ;;  %vm3054_vm14 = vcmp.eq.s32.totalorder %v1597_v33, %v2187_v16  ;;  %v200_v43 = vld [vmem:[%s1555_s4 + $0x150] sm:$0xff] }
  0x9c   : > { %v2461_v36 = vsel %vm3054_vm14, 0.0, %v172_v38  ;;  %vm3055_vm11 = vmmov %vm3054_vm14  ;;  %v2471_v20 = vsel %vm634_vm2, 0.0, %v174_v45  ;;  %vm657_vm3 = vcmp.eq.s32.totalorder %v1597_v33, %v2338_v26  ;;  %v2482_v16 = vsel %vm634_vm2, 0.0, %v175_v18  ;;  %v201_v38 = vld [vmem:[%s1555_s4 + $0x158] sm:$0xff] }
  0x9d   : > { %v2466_v13 = vsel %vm3055_vm11, 0.0, %v173_v29  ;;  %v2487_v41 = vsel %vm635_vm15, 0.0, %v176_v37  ;;  %v2492_v42 = vsel %vm635_vm15, 0.0, %v177_v47  ;;  %v2497_v5 = vsel %vm636_vm7, 0.0, %v178_v48  ;;  %v202_v29 = vld [vmem:[%s1555_s4 + $0x160] sm:$0xff]  ;;  %v203_v47 = vld [vmem:[%s1555_s4 + $0x168] sm:$0xff] }
  0x9e   : > { %v2506_v45 = vsel %vm636_vm7, 0.0, %v179_v49  ;;  %v2511_v39 = vsel %vm637_vm10, 0.0, %v180_v52  ;;  %v2516_v18 = vsel %vm637_vm10, 0.0, %v181_v55  ;;  %vm3058_vm2 = vcmp.eq.s32.totalorder %v1578_v19, %v2210_v63  ;;  %v204_v48 = vld [vmem:[%s1555_s4 + $0x170] sm:$0xff]  ;;  %v205_v49 = vld [vmem:[%s1555_s4 + $0x178] sm:$0xff] }
  0x9f   : > { %3056 = vst [vmem:[#allocation8_spill] sm:$0xff] %v2506_v45  ;;  %3057 = vst [vmem:[#allocation9_spill] sm:$0xff] %v2516_v18  ;;  %v2521_v37 = vsel %vm3058_vm2, 0.0, %v182_v57  ;;  %v206_v45 = vld [vmem:[%s1555_s4 + $0x180] sm:$0xff]  ;;  %vm3062_vm15 = vcmp.eq.s32.totalorder %v1597_v33, %v2210_v63  ;;  %vm3064_vm11 = vcmp.eq.s32.totalorder %v1578_v19, %v2215_v6  ;;  %v828_v26 = vmax.f32 %v2443_v28, %v2461_v36 }
  0xa0   : > { %3059 = vst [vmem:[#allocation10_spill] sm:$0xff] %v2521_v37  ;;  %vm3060_vm7 = vmmov %vm3058_vm2  ;;  %v2535_v58 = vsel %vm3062_vm15, 0.0, %v184_v56  ;;  %v2545_v57 = vsel %vm3064_vm11, 0.0, %v186_v46  ;;  %v207_v37 = vld [vmem:[%s1555_s4 + $0x188] sm:$0xff]  ;;  %v210_v18 = vld [vmem:[%s1555_s4 + $0x1a0] sm:$0xff]  ;;  %vm3068_vm2 = vcmp.eq.s32.totalorder %v1597_v33, %v2215_v6  ;;  %v2582_v6 = vsel %vm643_vm13, 0.0, %v192_v34 }
  0xa1   : > { %v2530_v52 = vsel %vm3060_vm7, 0.0, %v183_v61  ;;  %vm3063_vm10 = vmmov %vm3062_vm15  ;;  %3065 = vst [vmem:[#allocation12_spill] sm:$0xff] %v2545_v57  ;;  %v208_v61 = vld [vmem:[%s1555_s4 + $0x190] sm:$0xff]  ;;  %v2559_v63 = vsel %vm3068_vm2, 0.0, %v188_v60  ;;  %vm3070_vm15 = vcmp.eq.s32.totalorder %v1578_v19, %v2228_v4  ;;  %v211_v57 = vld [vmem:[%s1555_s4 + $0x1a8] sm:$0xff]  ;;  %v2604_v4 = vsel %vm645_vm12, 0.0, %v196_v40 }
  0xa2   : > { %3061 = vst [vmem:[#allocation11_spill] sm:$0xff] %v2530_v52  ;;  %v2540_v55 = vsel %vm3063_vm10, 0.0, %v185_v0  ;;  %v209_v52 = vld [vmem:[%s1555_s4 + $0x198] sm:$0xff]  ;;  %vm3066_vm14 = vmmov %vm3064_vm11  ;;  %v2569_v46 = vsel %vm3070_vm15, 0.0, %v190_v9  ;;  %vm3074_vm11 = vcmp.eq.s32.totalorder %v1578_v19, %v2233_v27  ;;  %v2609_v34 = vsel %vm645_vm12, 0.0, %v197_v12 }
  0xa3   : > { %v2554_v56 = vsel %vm3066_vm14, 0.0, %v187_v11  ;;  %vm3069_vm7 = vmmov %vm3068_vm2  ;;  %3071 = vst [vmem:[#allocation14_spill] sm:$0xff] %v2569_v46  ;;  %v212_v11 = vld [vmem:[%s1555_s4 + $0x1b0] sm:$0xff]  ;;  %v2592_v9 = vsel %vm3074_vm11, 0.0, %v194_v35  ;;  %v214_v46 = vld [vmem:[%s1555_s4 + $0x1c0] sm:$0xff]  ;;  %v2636_v12 = vsel %vm648_vm1, 0.0, %v202_v29 }
  0xa4   : > { %3067 = vst [vmem:[#allocation13_spill] sm:$0xff] %v2554_v56  ;;  %v2564_v0 = vsel %vm3069_vm7, 0.0, %v189_v3  ;;  %v213_v56 = vld [vmem:[%s1555_s4 + $0x1b8] sm:$0xff]  ;;  %vm3072_vm10 = vmmov %vm3070_vm15  ;;  %v2587_v3 = vsel %vm643_vm13, 0.0, %v193_v22  ;;  %vm3077_vm13 = vcmp.eq.s32.totalorder %v1578_v19, %v2250_v31  ;;  %v216_v35 = vld [vmem:[%s1555_s4 + $0x1d0] sm:$0xff]  ;;  %vm3080_vm7 = vcmp.eq.s32.totalorder %v1597_v33, %v2250_v31 }
  0xa5   : > { %v2577_v60 = vsel %vm3072_vm10, 0.0, %v191_v32  ;;  %v215_v32 = vld [vmem:[%s1555_s4 + $0x1c8] sm:$0xff]  ;;  %vm3075_vm14 = vmmov %vm3074_vm11  ;;  %v2614_v22 = vsel %vm3077_vm13, 0.0, %v198_v30  ;;  %v2626_v40 = vsel %vm3080_vm7, 0.0, %v200_v43  ;;  %3082 = vst [vmem:[#allocation18_spill] sm:$0xff] %v2636_v12  ;;  %v218_v30 = vld [vmem:[%s1555_s4 + $0x1e0] sm:$0xff]  ;;  %vm3083_vm15 = vcmp.eq.s32.totalorder %v1578_v19, %v2293_v14 }
  0xa6   : > { %3073 = vst [vmem:[#allocation15_spill] sm:$0xff] %v2577_v60  ;;  %v2599_v60 = vsel %vm3075_vm14, 0.0, %v195_v25  ;;  %3078 = vst [vmem:[#allocation17_spill] sm:$0xff] %v2614_v22  ;;  %v217_v25 = vld [vmem:[%s1555_s4 + $0x1d8] sm:$0xff]  ;;  %v219_v22 = vld [vmem:[%s1555_s4 + $0x1e8] sm:$0xff]  ;;  %v2648_v43 = vsel %vm649_vm6, 0.0, %v204_v48  ;;  %v821_v33 = vmax.f32 %v2428_v15, %v2438_v8 }
  0xa7   : > { %3076 = vst [vmem:[#allocation16_spill] sm:$0xff] %v2599_v60  ;;  %vm3079_vm2 = vmmov %vm3077_vm13  ;;  %v2653_v31 = vsel %vm649_vm6, 0.0, %v205_v49  ;;  %v220_v29 = vld [vmem:[%s1555_s4 + $0x1f0] sm:$0xff]  ;;  %v221_v12 = vld [vmem:[%s1555_s4 + $0x1f8] sm:$0xff]  ;;  %v2670_v48 = vsel %vm651_vm4, 0.0, %v208_v61  ;;  %v2675_v10 = vsel %vm651_vm4, 0.0, %v209_v52  ;;  %vm3085_vm6 = vcmp.eq.s32.totalorder %v1578_v19, %v2323_v17 }
  0xa8   : > { %v2621_v60 = vsel %vm3079_vm2, 0.0, %v199_v21  ;;  %vm3081_vm12 = vmmov %vm3080_vm7  ;;  %v2643_v21 = vsel %vm648_vm1, 0.0, %v203_v47  ;;  %v2690_v49 = vsel %vm653_vm9, 0.0, %v212_v11  ;;  %v2695_v14 = vsel %vm653_vm9, 0.0, %v213_v56 }
  0xa9   : > { %v2631_v27 = vsel %vm3081_vm12, 0.0, %v201_v38  ;;  %v2658_v38 = vsel %vm3083_vm15, 0.0, %v206_v45  ;;  %vm3084_vm1 = vmmov %vm3083_vm15  ;;  %v2680_v45 = vsel %vm652_vm0, 0.0, %v210_v18  ;;  %v2700_v18 = vsel %vm3085_vm6, 0.0, %v214_v46 }
  0xaa   : > { %v2665_v47 = vsel %vm3084_vm1, 0.0, %v207_v37  ;;  %v2685_v37 = vsel %vm652_vm0, 0.0, %v211_v57  ;;  %3086 = vst [vmem:[#allocation19_spill] sm:$0xff] %v2700_v18  ;;  %vm3087_vm4 = vmmov %vm3085_vm6  ;;  %v2710_v57 = vsel %vm655_vm5, 0.0, %v216_v35  ;;  %v2715_v24 = vsel %vm655_vm5, 0.0, %v217_v25 }
  0xab   : > { %v2705_v52 = vsel %vm3087_vm4, 0.0, %v215_v32  ;;  %3089 = vst [vmem:[#allocation21_spill] sm:$0xff] %v2710_v57  ;;  %3090 = vst [vmem:[#allocation22_spill] sm:$0xff] %v2715_v24  ;;  %v2720_v61 = vsel %vm656_vm8, 0.0, %v218_v30  ;;  %v2725_v56 = vsel %vm656_vm8, 0.0, %v219_v22  ;;  %v2730_v46 = vsel %vm657_vm3, 0.0, %v220_v29 }
  0xac   : > { %3088 = vst [vmem:[#allocation20_spill] sm:$0xff] %v2705_v52  ;;  %3091 = vst [vmem:[#allocation23_spill] sm:$0xff] %v2720_v61  ;;  %v2735_v17 = vsel %vm657_vm3, 0.0, %v221_v12  ;;  %v786_v11 = vmax.f32 %v2359_v44, %v2377_v50  ;;  %v793_v32 = vmax.f32 %v2372_v59, %v2382_v54  ;;  %v800_v19 = vmax.f32 %v2387_v51, %v2405_v62 }
  0xad   : > { %3092 = vst [vmem:[#allocation24_spill] sm:$0xff] %v2725_v56  ;;  %3093 = vst [vmem:[#allocation25_spill] sm:$0xff] %v2730_v46  ;;  %v807_v22 = vmax.f32 %v2400_v1, %v2410_v2  ;;  %v814_v35 = vmax.f32 %v2415_v7, %v2433_v23  ;;  %v835_v44 = vmax.f32 %v2456_v53, %v2466_v13  ;;  %v822_v12 = vrot.slane %v821_v33, 4 }
  0xae   : > { %3094 = vst [vmem:[#allocation26_spill] sm:$0xff] %v2735_v17  ;;  %v787_v25 = vrot.slane %v786_v11, 4  ;;  %v794_v59 = vrot.slane %v793_v32, 4  ;;  %v801_v50 = vrot.slane %v800_v19, 4  ;;  %v829_v1 = vrot.slane %v828_v26, 4 }
  0xaf   : > { %v808_v54 = vrot.slane %v807_v22, 4  ;;  %v815_v51 = vrot.slane %v814_v35, 4  ;;  %v836_v2 = vrot.slane %v835_v44, 4  ;;  %v823_v15 = vmax.f32 %v821_v33, %v822_v12 }
  0xb0   : > { %v788_v62 = vmax.f32 %v786_v11, %v787_v25  ;;  %v795_v30 = vmax.f32 %v793_v32, %v794_v59  ;;  %v802_v7 = vmax.f32 %v800_v19, %v801_v50  ;;  %v830_v8 = vmax.f32 %v828_v26, %v829_v1 }
  0xb1   : > { %v809_v23 = vmax.f32 %v807_v22, %v808_v54  ;;  %v816_v29 = vmax.f32 %v814_v35, %v815_v51  ;;  %v837_v17 = vmax.f32 %v835_v44, %v836_v2  ;;  %v824_v46 = vrot.slane %v823_v15, 2 }
  0xb2   : > { %v789_v56 = vrot.slane %v788_v62, 2  ;;  %v796_v28 = vrot.slane %v795_v30, 2  ;;  %v803_v36 = vrot.slane %v802_v7, 2  ;;  %v831_v52 = vrot.slane %v830_v8, 2 }
  0xb3   : > { %v810_v61 = vrot.slane %v809_v23, 2  ;;  %v817_v53 = vrot.slane %v816_v29, 2  ;;  %v838_v24 = vrot.slane %v837_v17, 2  ;;  %v825_v19 = vmax.f32 %v823_v15, %v824_v46 }
  0xb4   : > { %v790_v13 = vmax.f32 %v788_v62, %v789_v56  ;;  %v797_v11 = vmax.f32 %v795_v30, %v796_v28  ;;  %v804_v25 = vmax.f32 %v802_v7, %v803_v36  ;;  %v832_v22 = vmax.f32 %v830_v8, %v831_v52  ;;  %v3095_v7 = vld [vmem:[#allocation9_spill] sm:$0xff]  ;;  %v3098_v8 = vld [vmem:[#allocation11_spill] sm:$0xff]  ;;  %v3099_v36 = vld [vmem:[#allocation12_spill] sm:$0xff] }
  0xb5   : > { %v811_v18 = vmax.f32 %v809_v23, %v810_v61  ;;  %v818_v57 = vmax.f32 %v816_v29, %v817_v53  ;;  %v839_v35 = vmax.f32 %v837_v17, %v838_v24  ;;  %v826_v54 = vrot.slane %v825_v19, 1 }
  0xb6   : > { %v791_v32 = vrot.slane %v790_v13, 1  ;;  %v798_v59 = vrot.slane %v797_v11, 1  ;;  %v805_v33 = vrot.slane %v804_v25, 1  ;;  %v833_v51 = vrot.slane %v832_v22, 1 }
  0xb7   : > { %v812_v26 = vrot.slane %v811_v18, 1  ;;  %v819_v44 = vrot.slane %v818_v57, 1  ;;  %v840_v56 = vrot.slane %v839_v35, 1  ;;  %v2763_v46 = vmax.f32 %v825_v19, %v826_v54 }
  0xb8   : > { %v2753_v50 = vmax.f32 %v790_v13, %v791_v32  ;;  %v2755_v62 = vmax.f32 %v797_v11, %v798_v59  ;;  %v2757_v12 = vmax.f32 %v804_v25, %v805_v33  ;;  %v2765_v52 = vmax.f32 %v832_v22, %v833_v51 }
  0xb9   : > { %v2759_v1 = vmax.f32 %v811_v18, %v812_v26  ;;  %v2761_v61 = vmax.f32 %v818_v57, %v819_v44  ;;  %v2767_v24 = vmax.f32 %v839_v35, %v840_v56  ;;  %v842_v17 = vmax.f32 %v2471_v20, %v2487_v41  ;;  %v3096_v18 = vld [vmem:[#allocation8_spill] sm:$0xff]  ;;  %v3097_v57 = vld [vmem:[#allocation10_spill] sm:$0xff]  ;;  %v3100_v20 = vld [vmem:[#allocation13_spill] sm:$0xff] }
  0xba   : > { %v849_v2 = vmax.f32 %v2482_v16, %v2492_v42  ;;  %v856_v30 = vmax.f32 %v2497_v5, %v2511_v39  ;;  %v863_v23 = vmax.f32 %v3096_v18, %v3095_v7  ;;  %v870_v29 = vmax.f32 %v3097_v57, %v2535_v58 }
  0xbb   : > { %v843_v15 = vrot.slane %v842_v17, 4  ;;  %v877_v28 = vmax.f32 %v3098_v8, %v2540_v55  ;;  %v884_v53 = vmax.f32 %v3099_v36, %v2559_v63  ;;  %v891_v41 = vmax.f32 %v3100_v20, %v2564_v0 }
  0xbc   : > { %v850_v16 = vrot.slane %v849_v2, 4  ;;  %v857_v42 = vrot.slane %v856_v30, 4  ;;  %v864_v13 = vrot.slane %v863_v23, 4  ;;  %v871_v5 = vrot.slane %v870_v29, 4 }
  0xbd   : > { %v844_v39 = vmax.f32 %v842_v17, %v843_v15  ;;  %v878_v11 = vrot.slane %v877_v28, 4  ;;  %v885_v25 = vrot.slane %v884_v53, 4  ;;  %v892_v32 = vrot.slane %v891_v41, 4 }
  0xbe   : > { %v851_v19 = vmax.f32 %v849_v2, %v850_v16  ;;  %v858_v58 = vmax.f32 %v856_v30, %v857_v42  ;;  %v865_v22 = vmax.f32 %v863_v23, %v864_v13  ;;  %v872_v35 = vmax.f32 %v870_v29, %v871_v5 }
  0xbf   : > { %v845_v59 = vrot.slane %v844_v39, 2  ;;  %v879_v55 = vmax.f32 %v877_v28, %v878_v11  ;;  %v886_v33 = vmax.f32 %v884_v53, %v885_v25  ;;  %v893_v26 = vmax.f32 %v891_v41, %v892_v32 }
  0xc0   : > { %v852_v63 = vrot.slane %v851_v19, 2  ;;  %v859_v44 = vrot.slane %v858_v58, 2  ;;  %v866_v54 = vrot.slane %v865_v22, 2  ;;  %v873_v0 = vrot.slane %v872_v35, 2 }
  0xc1   : > { %v846_v51 = vmax.f32 %v844_v39, %v845_v59  ;;  %v880_v56 = vrot.slane %v879_v55, 2  ;;  %v887_v7 = vrot.slane %v886_v33, 2  ;;  %v894_v18 = vrot.slane %v893_v26, 2  ;;  %v3102_v59 = vld [vmem:[#allocation15_spill] sm:$0xff] }
  0xc2   : > { %v853_v17 = vmax.f32 %v851_v19, %v852_v63  ;;  %v860_v57 = vmax.f32 %v858_v58, %v859_v44  ;;  %v867_v15 = vmax.f32 %v865_v22, %v866_v54  ;;  %v874_v8 = vmax.f32 %v872_v35, %v873_v0  ;;  %v3101_v22 = vld [vmem:[#allocation14_spill] sm:$0xff]  ;;  %v3104_v44 = vld [vmem:[#allocation17_spill] sm:$0xff] }
  0xc3   : > { %v847_v2 = vrot.slane %v846_v51, 1  ;;  %v881_v30 = vmax.f32 %v879_v55, %v880_v56  ;;  %v888_v23 = vmax.f32 %v886_v33, %v887_v7  ;;  %v895_v29 = vmax.f32 %v893_v26, %v894_v18  ;;  %v3103_v26 = vld [vmem:[#allocation16_spill] sm:$0xff]  ;;  %v3105_v56 = vld [vmem:[#allocation18_spill] sm:$0xff] }
  0xc4   : > { %v854_v36 = vrot.slane %v853_v17, 1  ;;  %v861_v28 = vrot.slane %v860_v57, 1  ;;  %v868_v53 = vrot.slane %v867_v15, 1  ;;  %v875_v20 = vrot.slane %v874_v8, 1 }
  0xc5   : > { %v2785_v41 = vmax.f32 %v846_v51, %v847_v2  ;;  %v882_v16 = vrot.slane %v881_v30, 1  ;;  %v889_v42 = vrot.slane %v888_v23, 1  ;;  %v896_v13 = vrot.slane %v895_v29, 1 }
  0xc6   : > { %v2787_v5 = vmax.f32 %v853_v17, %v854_v36  ;;  %v2789_v39 = vmax.f32 %v860_v57, %v861_v28  ;;  %v2791_v11 = vmax.f32 %v867_v15, %v868_v53  ;;  %v2793_v25 = vmax.f32 %v874_v8, %v875_v20 }
  0xc7   : > { %v2795_v32 = vmax.f32 %v881_v30, %v882_v16  ;;  %v2797_v19 = vmax.f32 %v888_v23, %v889_v42  ;;  %v2799_v58 = vmax.f32 %v895_v29, %v896_v13  ;;  %v898_v35 = vmax.f32 %v3101_v22, %v2582_v6 }
  0xc8   : > { %v905_v55 = vmax.f32 %v3102_v59, %v2587_v3  ;;  %v912_v33 = vmax.f32 %v2592_v9, %v2604_v4  ;;  %v919_v63 = vmax.f32 %v3103_v26, %v2609_v34  ;;  %v926_v54 = vmax.f32 %v3104_v44, %v2626_v40 }
  0xc9   : > { %v899_v0 = vrot.slane %v898_v35, 4  ;;  %v933_v51 = vmax.f32 %v2621_v60, %v2631_v27  ;;  %v940_v7 = vmax.f32 %v3105_v56, %v2648_v43  ;;  %v947_v6 = vmax.f32 %v2643_v21, %v2653_v31 }
  0xca   : > { %v906_v3 = vrot.slane %v905_v55, 4  ;;  %v913_v18 = vrot.slane %v912_v33, 4  ;;  %v920_v17 = vrot.slane %v919_v63, 4  ;;  %v927_v9 = vrot.slane %v926_v54, 4 }
  0xcb   : > { %v900_v4 = vmax.f32 %v898_v35, %v899_v0  ;;  %v934_v57 = vrot.slane %v933_v51, 4  ;;  %v941_v34 = vrot.slane %v940_v7, 4  ;;  %v948_v15 = vrot.slane %v947_v6, 4 }
  0xcc   : > { %v907_v8 = vmax.f32 %v905_v55, %v906_v3  ;;  %v914_v40 = vmax.f32 %v912_v33, %v913_v18  ;;  %v921_v2 = vmax.f32 %v919_v63, %v920_v17  ;;  %v928_v30 = vmax.f32 %v926_v54, %v927_v9 }
  0xcd   : > { %v901_v23 = vrot.slane %v900_v4, 2  ;;  %v935_v60 = vmax.f32 %v933_v51, %v934_v57  ;;  %v942_v27 = vmax.f32 %v940_v7, %v941_v34  ;;  %v949_v29 = vmax.f32 %v947_v6, %v948_v15 }
  0xce   : > { %v908_v43 = vrot.slane %v907_v8, 2  ;;  %v915_v36 = vrot.slane %v914_v40, 2  ;;  %v922_v28 = vrot.slane %v921_v2, 2  ;;  %v929_v21 = vrot.slane %v928_v30, 2 }
  0xcf   : > { %v902_v31 = vmax.f32 %v900_v4, %v901_v23  ;;  %v936_v53 = vrot.slane %v935_v60, 2  ;;  %v943_v20 = vrot.slane %v942_v27, 2  ;;  %v950_v16 = vrot.slane %v949_v29, 2  ;;  %v3107_v23 = vld [vmem:[#allocation19_spill] sm:$0xff] }
  0xd0   : > { %v909_v42 = vmax.f32 %v907_v8, %v908_v43  ;;  %v916_v13 = vmax.f32 %v914_v40, %v915_v36  ;;  %v923_v22 = vmax.f32 %v921_v2, %v922_v28  ;;  %v930_v35 = vmax.f32 %v928_v30, %v929_v21  ;;  %v3106_v30 = vld [vmem:[#allocation21_spill] sm:$0xff]  ;;  %v3109_v43 = vld [vmem:[#allocation20_spill] sm:$0xff]  ;;  %v3111_v21 = vld [vmem:[#allocation23_spill] sm:$0xff] }
  0xd1   : > { %v903_v59 = vrot.slane %v902_v31, 1  ;;  %v937_v55 = vmax.f32 %v935_v60, %v936_v53  ;;  %v944_v33 = vmax.f32 %v942_v27, %v943_v20  ;;  %v951_v26 = vmax.f32 %v949_v29, %v950_v16  ;;  %v3108_v29 = vld [vmem:[#allocation22_spill] sm:$0xff]  ;;  %v3110_v28 = vld [vmem:[#allocation25_spill] sm:$0xff] }
  0xd2   : > { %v910_v63 = vrot.slane %v909_v42, 1  ;;  %v917_v44 = vrot.slane %v916_v13, 1  ;;  %v924_v54 = vrot.slane %v923_v22, 1  ;;  %v931_v0 = vrot.slane %v930_v35, 1 }
  0xd3   : > { %v2817_v51 = vmax.f32 %v902_v31, %v903_v59  ;;  %v938_v56 = vrot.slane %v937_v55, 1  ;;  %v945_v7 = vrot.slane %v944_v33, 1  ;;  %v952_v6 = vrot.slane %v951_v26, 1 }
  0xd4   : > { %v2819_v3 = vmax.f32 %v909_v42, %v910_v63  ;;  %v2821_v18 = vmax.f32 %v916_v13, %v917_v44  ;;  %v2823_v17 = vmax.f32 %v923_v22, %v924_v54  ;;  %v2825_v9 = vmax.f32 %v930_v35, %v931_v0 }
  0xd5   : > { %v2827_v4 = vmax.f32 %v937_v55, %v938_v56  ;;  %v2829_v57 = vmax.f32 %v944_v33, %v945_v7  ;;  %v2831_v34 = vmax.f32 %v951_v26, %v952_v6  ;;  %v954_v15 = vmax.f32 %v2658_v38, %v2670_v48  ;;  %v3112_v38 = vld [vmem:[#allocation26_spill] sm:$0xff]  ;;  %v3113_v48 = vld [vmem:[#allocation24_spill] sm:$0xff] }
  0xd6   : > { %v961_v8 = vmax.f32 %v2665_v47, %v2675_v10  ;;  %v968_v40 = vmax.f32 %v2680_v45, %v2690_v49  ;;  %v975_v2 = vmax.f32 %v2685_v37, %v2695_v14  ;;  %v982_v60 = vmax.f32 %v3107_v23, %v3106_v30 }
  0xd7   : > { %v955_v27 = vrot.slane %v954_v15, 4  ;;  %v989_v36 = vmax.f32 %v3109_v43, %v3108_v29  ;;  %v996_v31 = vmax.f32 %v3111_v21, %v3110_v28  ;;  %v1003_v53 = vmax.f32 %v3113_v48, %v3112_v38 }
  0xd8   : > { %v962_v47 = vrot.slane %v961_v8, 4  ;;  %v969_v10 = vrot.slane %v968_v40, 4  ;;  %v976_v20 = vrot.slane %v975_v2, 4  ;;  %v983_v45 = vrot.slane %v982_v60, 4 }
  0xd9   : > { %v956_v49 = vmax.f32 %v954_v15, %v955_v27  ;;  %v990_v16 = vrot.slane %v989_v36, 4  ;;  %v997_v37 = vrot.slane %v996_v31, 4  ;;  %v1004_v14 = vrot.slane %v1003_v53, 4 }
  0xda   : > { %v963_v42 = vmax.f32 %v961_v8, %v962_v47  ;;  %v970_v13 = vmax.f32 %v968_v40, %v969_v10  ;;  %v977_v22 = vmax.f32 %v975_v2, %v976_v20  ;;  %v984_v35 = vmax.f32 %v982_v60, %v983_v45 }
  0xdb   : > { %v957_v59 = vrot.slane %v956_v49, 2  ;;  %v991_v55 = vmax.f32 %v989_v36, %v990_v16  ;;  %v998_v33 = vmax.f32 %v996_v31, %v997_v37  ;;  %v1005_v26 = vmax.f32 %v1003_v53, %v1004_v14 }
  0xdc   : > { %v964_v63 = vrot.slane %v963_v42, 2  ;;  %v971_v44 = vrot.slane %v970_v13, 2  ;;  %v978_v54 = vrot.slane %v977_v22, 2  ;;  %v985_v0 = vrot.slane %v984_v35, 2 }
  0xdd   : > { %v958_v56 = vmax.f32 %v956_v49, %v957_v59  ;;  %v992_v7 = vrot.slane %v991_v55, 2  ;;  %v999_v6 = vrot.slane %v998_v33, 2  ;;  %v1006_v15 = vrot.slane %v1005_v26, 2 }
  0xde   : > { %v965_v30 = vmax.f32 %v963_v42, %v964_v63  ;;  %v972_v23 = vmax.f32 %v970_v13, %v971_v44  ;;  %v979_v27 = vmax.f32 %v977_v22, %v978_v54  ;;  %v986_v8 = vmax.f32 %v984_v35, %v985_v0 }
  0xdf   : > { %v959_v40 = vrot.slane %v958_v56, 1  ;;  %v993_v2 = vmax.f32 %v991_v55, %v992_v7  ;;  %v1000_v60 = vmax.f32 %v998_v33, %v999_v6  ;;  %v1007_v29 = vmax.f32 %v1005_v26, %v1006_v15 }
  0xe0   : > { %v966_v43 = vrot.slane %v965_v30, 1  ;;  %v973_v36 = vrot.slane %v972_v23, 1  ;;  %v980_v28 = vrot.slane %v979_v27, 1  ;;  %v987_v21 = vrot.slane %v986_v8, 1 }
  0xe1   : > { %v960_v31 = vmax.f32 %v958_v56, %v959_v40  ;;  %v994_v38 = vrot.slane %v993_v2, 1  ;;  %v1001_v48 = vrot.slane %v1000_v60, 1  ;;  %v1008_v53 = vrot.slane %v1007_v29, 1 }
  0xe2   : > { %v967_v47 = vmax.f32 %v965_v30, %v966_v43  ;;  %v974_v10 = vmax.f32 %v972_v23, %v973_v36  ;;  %v981_v20 = vmax.f32 %v979_v27, %v980_v28  ;;  %v988_v45 = vmax.f32 %v986_v8, %v987_v21 }
  0xe3   : > { %v995_v49 = vmax.f32 %v993_v2, %v994_v38  ;;  %v1002_v16 = vmax.f32 %v1000_v60, %v1001_v48  ;;  %v1009_v37 = vmax.f32 %v1007_v29, %v1008_v53  ;;  %vm1042_vm0 = vcmask 1041409  }
  0xe4   : > { %v1043_v14 = vsel %vm1042_vm0, %v2757_v12, %v2753_v50  ;;  %vm1044_vm9 = vcmask 1042434   ;;  %vm1046_vm5 = vcmask 1043459   ;;  %vm1048_vm8 = vcmask 1044484  }
  0xe5   : > { %v1045_v42 = vsel %vm1044_vm9, %v2761_v61, %v1043_v14  ;;  %vm1050_vm3 = vcmask 1045509   ;;  %vm1052_vm10 = vcmask 1046534   ;;  %vm1054_vm11 = vcmask 1047559  }
  0xe6   : > { %v1047_v13 = vsel %vm1046_vm5, %v2765_v52, %v1045_v42  ;;  %v1056_v22 = vsel %vm1042_vm0, %v2759_v1, %v2755_v62  ;;  %v1063_v35 = vsel %vm1042_vm0, %v2821_v18, %v2817_v51  ;;  %v1070_v50 = vsel %vm1042_vm0, %v2823_v17, %v2819_v3 }
  0xe7   : > { %v1049_v12 = vsel %vm1048_vm8, %v2785_v41, %v1047_v13  ;;  %v1057_v61 = vsel %vm1044_vm9, %v2763_v46, %v1056_v22  ;;  %v1064_v59 = vsel %vm1044_vm9, %v2825_v9, %v1063_v35  ;;  %v1071_v55 = vsel %vm1044_vm9, %v2827_v4, %v1070_v50 }
  0xe8   : > { %v1051_v62 = vsel %vm1050_vm3, %v2789_v39, %v1049_v12  ;;  %v1058_v1 = vsel %vm1046_vm5, %v2767_v24, %v1057_v61  ;;  %v1065_v52 = vsel %vm1046_vm5, %v2829_v57, %v1064_v59  ;;  %v1072_v46 = vsel %vm1046_vm5, %v2831_v34, %v1071_v55 }
  0xe9   : > { %v1053_v41 = vsel %vm1052_vm10, %v2793_v25, %v1051_v62  ;;  %v1059_v51 = vsel %vm1048_vm8, %v2787_v5, %v1058_v1  ;;  %v1066_v3 = vsel %vm1048_vm8, %v960_v31, %v1065_v52  ;;  %v1073_v18 = vsel %vm1048_vm8, %v967_v47, %v1072_v46 }
  0xea   : > { %v1055_v39 = vsel %vm1054_vm11, %v2797_v19, %v1053_v41  ;;  %v1060_v24 = vsel %vm1050_vm3, %v2791_v11, %v1059_v51  ;;  %v1067_v17 = vsel %vm1050_vm3, %v974_v10, %v1066_v3  ;;  %v1074_v9 = vsel %vm1050_vm3, %v981_v20, %v1073_v18 }
  0xeb   : > { %v1061_v5 = vsel %vm1052_vm10, %v2795_v32, %v1060_v24  ;;  %v1068_v25 = vsel %vm1052_vm10, %v988_v45, %v1067_v17  ;;  %v1075_v11 = vsel %vm1052_vm10, %v995_v49, %v1074_v9  ;;  %1081 = vst [vmem:[%s153_s30] sm:$0xff] %v1055_v39 }
  0xec   : > { %v1062_v19 = vsel %vm1054_vm11, %v2799_v58, %v1061_v5  ;;  %v1069_v4 = vsel %vm1054_vm11, %v1002_v16, %v1068_v25  ;;  %v1076_v57 = vsel %vm1054_vm11, %v1009_v37, %v1075_v11 }
  0xed   : > { %1082 = vst [vmem:[%s153_s30 + $0x8] sm:$0xff] %v1062_v19  ;;  %1083 = vst [vmem:[%s153_s30 + $0x10] sm:$0xff] %v1069_v4 }
  0xee   : > { %1084 = vst [vmem:[%s153_s30 + $0x18] sm:$0xff] %v1076_v57 }
  0xef   : > { %1352 = shalt.err (!%p1349_p5)
}
  0xf0   : > { %s1353_s23 = scalar_lea.hbm %s2892_s12, 512  ;;  %s1357_s28 = scalar_lea.hbm %s2952_s1, 1024 }
  0xf1   : > { %p1354_p4 = scmp.ne.s32.totalorder %s2892_s12, %s1353_s23  ;;  %p1358_p12 = scmp.lt.u32.totalorder %s2892_s12, %s2952_s1 }
  0xf2   : > { %p1359_p1 = scmp.lt.u32.totalorder %s1357_s28, %s1353_s23  ;;  %p1361_p8 = scmp.lt.u32.totalorder %s1353_s23, %s2892_s12 }
  0xf3   : > { %p1355_p7 = pnand %p1354_p4, %p3114_p9 }
  0xf4   : > { %p1360_p3 = por %p1359_p1, %p1358_p12 }
  0xf5   : > { %p1356_p10 = pneg %p1355_p7 }
  0xf6   : > { %p1362_p11 = por %p1361_p8, %p1360_p3 }
  0xf8   : > { %p1363_p0 = pnand %p1362_p11, %p1356_p10 }
  0xfa   : > { %1366 = shalt.err (!%p1363_p0)
}
  0xfb   : > { %s1427_s27 = smov 256   ;;  %s1428_s18 = smov 16  }
  0xfc   : > { %1245 = dma.vmem_to_hbm [thread:$0]  (%p3114_p9), %s2894_s2, 512, %s2892_s12, %s1086_s13, %s1427_s27, %s1427_s27, %s1428_s18  }
  0xfd PF: > { %s1117_s29 = sand.u32 1, %s1401_s6   ;;  %p3115_p6 = scmp.ne.s32.totalorder %s2957_s21, 0 }
  0xfe   : > { %p3116_p13 = scmp.ge.s32.totalorder %s1421_s11, 2  ;;  %s1118_s30 = scalar_lea.sflag [#allocation4], %s1117_s29 }
 0x100   : > { %p1252_p2 = pnand %p3116_p13, %p3115_p6 }
 0x102   : > { %1396 = dma.done.wait (!%p1252_p2), %s1118_s30, 512  }
 0x103   : > { %1398 = vsyncadd (!%p1252_p2), %s1118_s30, 4294966784  ;;  %s17_s11 = sadd.s32 1, %s1421_s11   ;;  %s3117_s6 = smov %s1405_s7 }
 0x104   : > { %p14_p5 = scmp.ge.s32.totalorder %s17_s11, 4   ;;  %s3118_s7 = smov %s1409_s8 }
 0x105   : > { %s3119_s8 = smov %s1495_s20  ;;  %s3120_s9 = smov %s1417_s10 }
 0x106   : > { %s3121_s10 = smov %s3123_s14  ;;  %16 = sbr.rel (!%p14_p5) target bundleno = 6 (0x6), region = 69 }
 0x10d   :  { %1123 = vsyncpa [#allocation3], 1 }
 0x10e   :  { %1125 = vsyncpa [#allocation3 + $0x1], 1 }
 0x10f   :  { %1126 = vsyncpa [#allocation4], 1 }
 0x110   :  { %1128 = vsyncpa [#allocation4 + $0x1], 1 }

</bundles_post_ra>
